<compile_context>
chip_gen: v6e
topology: v6e:2x2x1
jax: 0.10.0
libtpu: 0.0.40
codegen_flags: <defaults>
</compile_context>

<pallas_src>
import numpy as np
import jax
import jax.numpy as jnp
from jax.experimental import pallas as pl
from jax.experimental.pallas import tpu as pltpu


# ----------------------------------------------------------------------------
# Fused forward kernel
# ----------------------------------------------------------------------------

def _bn_train(h, gamma, beta, eps=1e-5):
    """BatchNorm1d, training-mode batch statistics, biased variance (f32 math)."""
    mu = jnp.mean(h, axis=0, keepdims=True)
    var = jnp.mean((h - mu) * (h - mu), axis=0, keepdims=True)
    return (h - mu) * jax.lax.rsqrt(var + eps) * gamma + beta


def _cnn_fused_kernel(x_ref, bw1_ref, bt1_ref, bw2_ref, bt2_ref,
                      w1_ref, g1_ref, be1_ref, w2_ref, g2_ref, be2_ref,
                      w3_ref, b3_ref, s0_ref, o_ref):
    """Whole CNN forward for the whole (small) batch, resident in VMEM.

    x_ref : (32*N, 96)  bf16  padded NHWC input; row b*32+h = padded row h of image b,
                              lanes are (w, c)-interleaved (w*3 + c).
    bw1   : (3, 96, 180) bf16 banded conv1 weights, output cols [even-w | odd-w], c-minor.
    bt1   : (1, 90)  f32      conv1 bias tiled over the 15 pooled w positions.
    bw2   : (5, 90, 160) bf16 banded conv2 weights, output cols [even-w | odd-w].
    bt2   : (1, 80)  f32      conv2 bias tiled over the 5 pooled w positions.
    w1    : (5, 80, 128) bf16 fc1 weights split per pooled NHWC row h.
    w2,w3 : (128, 128) bf16   fc2 / fc3 weights (feature dims zero-padded to 128).
    s0    : (N, 32*N-29) f32  0/1 selection matrix picking row 32*b of the fc1 stack.
    o_ref : (N, 6)   f32      logits.
    """
    f32 = jnp.float32
    bf16 = jnp.bfloat16

    # ---------------- conv1 (3->6, k3, pad2) + ReLU + maxpool 2x2 ----------------
    x = x_ref[...]                                                    # (32N, 96) bf16
    m = x.shape[0]
    p1 = [jnp.dot(x, bw1_ref[i], preferred_element_type=f32) for i in range(3)]
    lc1 = m - 2
    c1 = p1[0][0:lc1] + p1[1][1:1 + lc1] + p1[2][2:2 + lc1]          # conv row r at flat row r
    lh1 = lc1 - 1
    hp1 = jnp.maximum(c1[0:lh1], c1[1:1 + lh1])                      # H-pool: rows (r, r+1)
    y1 = jnp.maximum(jnp.maximum(hp1[:, :90], hp1[:, 90:]) + bt1_ref[...], 0.0)
    y1 = y1.astype(bf16)        # (32N-3, 90); pooled NHWC row p of image b at flat row b*32+2p

    # ---------------- conv2 (6->16, k5) + ReLU + maxpool 2x2 ---------------------
    p2 = [jnp.dot(y1, bw2_ref[i], preferred_element_type=f32) for i in range(5)]
    lc2 = lh1 - 8
    c2 = p2[0][0:lc2]
    for i in range(1, 5):
        c2 = c2 + p2[i][2 * i:2 * i + lc2]                           # conv2 row r at flat row 2r
    lh2 = lc2 - 2
    d2 = jnp.maximum(c2[0:lh2], c2[2:2 + lh2])                       # H-pool: flat rows (4p, 4p+2)
    y2 = jnp.maximum(jnp.maximum(d2[:, :80], d2[:, 80:]) + bt2_ref[...], 0.0)
    y2 = y2.astype(bf16)        # (32N-13, 80); pooled NHWC row h of image b at flat row b*32+4h

    # ---------------- fc1 + BN + ReLU ---------------------------------------------
    lg = lh2 - 16
    g = jnp.dot(y2[0:lg], w1_ref[0], preferred_element_type=f32)
    for h in range(1, 5):
        g = g + jnp.dot(y2[4 * h:4 * h + lg], w1_ref[h], preferred_element_type=f32)
    # Row 32*b of g is image b's fc1 pre-activation; s0 compacts those N rows.
    h1 = jnp.dot(s0_ref[...], g, preferred_element_type=f32)         # (N, 128) f32
    # fc1/fc2 biases omitted: a per-feature constant shift cancels exactly in
    # training-mode BatchNorm ((h + b) - mean(h + b) == h - mean(h)).
    h1 = jnp.maximum(_bn_train(h1, g1_ref[...], be1_ref[...]), 0.0)

    # ---------------- fc2 + BN + ReLU, fc3 ----------------------------------------
    h2 = jnp.dot(h1.astype(bf16), w2_ref[...], preferred_element_type=f32)
    h2 = jnp.maximum(_bn_train(h2, g2_ref[...], be2_ref[...]), 0.0)
    logits = jnp.dot(h2.astype(bf16), w3_ref[...], preferred_element_type=f32) + b3_ref[...]
    o_ref[...] = logits[:, :o_ref.shape[1]]


# ----------------------------------------------------------------------------
# pallas_call wrapper (single launch for the whole forward)
# ----------------------------------------------------------------------------

def _vmem_spec():
    return pl.BlockSpec(memory_space=pltpu.MemorySpace.VMEM)


def cnn_forward(x_nchw, kp):
    n = x_nchw.shape[0]
    # NCHW -> NHWC, conv1 padding=2, rows flattened to (w, c)-interleaved 96 lanes.
    x = jnp.transpose(x_nchw, (0, 2, 3, 1)).astype(jnp.float32)
    x = jnp.pad(x, ((0, 0), (2, 2), (2, 2), (0, 0)))                 # (N, 32, 32, 3)
    x = x.reshape(n * 32, 32 * 3).astype(jnp.bfloat16)               # (32N, 96)

    # Trace-time constant: picks flat row 32*b (image b) out of the fc1 partial-sum stack.
    s0 = np.zeros((n, 32 * n - 29), np.float32)
    s0[np.arange(n), 32 * np.arange(n)] = 1.0

    args = (x, kp["bw1"], kp["bt1"], kp["bw2"], kp["bt2"],
            kp["w_fc1"], kp["g_bn1"], kp["be_bn1"],
            kp["w_fc2"], kp["g_bn2"], kp["be_bn2"],
            kp["w_fc3"], kp["b_fc3"], jnp.asarray(s0))
    return pl.pallas_call(
        _cnn_fused_kernel,
        out_shape=jax.ShapeDtypeStruct((n, 6), jnp.float32),
        in_specs=[_vmem_spec()] * len(args),
        out_specs=_vmem_spec(),
    )(*args)


# ----------------------------------------------------------------------------
# host-side (one-time) parameter preparation from PyTorch-layout weights
# ----------------------------------------------------------------------------

def _banded_conv_weight(w_oihw, wp, qo):
    """PyTorch (Cout,Cin,KH,KW) conv weight -> (KH, Wp*Cin, 2*Qo*Cout) bf16 banded matrix.
    Row index = w_in*Cin + c of a (w, c)-interleaved padded input row; output columns are
    [even-w block | odd-w block] (pool-pair friendly), Cout-minor.  Output positions
    wo >= 2*Qo (dropped by floor pooling) are omitted."""
    w = np.asarray(w_oihw, np.float32).transpose(2, 3, 1, 0)         # (KH, KW, Cin, Cout)
    kh, kw, cin, cout = w.shape
    wu = 2 * qo
    bmat = np.zeros((kh, wp * cin, wu * cout), np.float32)
    for i in range(kh):
        for wo in range(wu):
            col = (wo // 2) * cout + (qo * cout if wo % 2 else 0)
            for j in range(kw):
                win = wo + j
                bmat[i, win * cin:(win + 1) * cin, col:col + cout] = w[i, j]
    return jnp.asarray(bmat, jnp.bfloat16)


def _pad2d(w, rows, cols):
    out = np.zeros((rows, cols), np.float32)
    out[:w.shape[0], :w.shape[1]] = w
    return out


def _pad_row(v, cols, fill=0.0):
    v = np.asarray(v, np.float32)
    out = np.full((1, cols), fill, np.float32)
    out[0, :v.shape[0]] = v
    return out


def prepare_params(p):
    """Convert PyTorch-layout parameters into the kernel-ready layout (host side)."""
    kp = {}
    # conv1: 28x28 pad 2 -> Wp=32, 3x3 conv -> 30, pool -> Qo=15
    kp["bw1"] = _banded_conv_weight(p["conv1.weight"], wp=32, qo=15)              # (3, 96, 180)
    kp["bt1"] = jnp.asarray(np.tile(np.asarray(p["conv1.bias"], np.float32), 15)[None, :])
    # conv2: 15x15 -> 5x5 conv -> 11, pool(floor) -> Qo=5
    kp["bw2"] = _banded_conv_weight(p["conv2.weight"], wp=15, qo=5)               # (5, 90, 160)
    kp["bt2"] = jnp.asarray(np.tile(np.asarray(p["conv2.bias"], np.float32), 5)[None, :])

    # fc1: PyTorch (120,400) expects NCHW flatten (c*25 + h*5 + w).  Permute rows to
    # NHWC flatten order (h*5 + w)*16 + c, pad 120 -> 128 features, and split into the
    # 5 per-pooled-row (80, 128) blocks the kernel contracts against.
    w1 = np.asarray(p["fc1.weight"], np.float32).T                                # (400, 120)
    w1 = w1.reshape(16, 5, 5, 120).transpose(1, 2, 0, 3).reshape(400, 120)
    kp["w_fc1"] = jnp.asarray(_pad2d(w1, 400, 128).reshape(5, 80, 128), jnp.bfloat16)
    kp["g_bn1"] = jnp.asarray(_pad_row(p["bn1.weight"], 128, fill=1.0))
    kp["be_bn1"] = jnp.asarray(_pad_row(p["bn1.bias"], 128))
    # fc2 (120 -> 84) + bn2, padded to 128x128 (zero rows/cols are inert).
    kp["w_fc2"] = jnp.asarray(_pad2d(np.asarray(p["fc2.weight"], np.float32).T, 128, 128),
                              jnp.bfloat16)
    kp["g_bn2"] = jnp.asarray(_pad_row(p["bn2.weight"], 128, fill=1.0))
    kp["be_bn2"] = jnp.asarray(_pad_row(p["bn2.bias"], 128))
    # fc3 (84 -> 6), padded to 128x128; the kernel stores only the first 6 logit lanes.
    kp["w_fc3"] = jnp.asarray(_pad2d(np.asarray(p["fc3.weight"], np.float32).T, 128, 128),
                              jnp.bfloat16)
    kp["b_fc3"] = jnp.asarray(_pad_row(p["fc3.bias"], 128))
    return kp


# ----------------------------------------------------------------------------
# deterministic parameter init (PyTorch-native layouts)
# ----------------------------------------------------------------------------

def init_params(key):
    ks = jax.random.split(key, 10)

    def rnd(k, shape, scale):
        return (scale * jax.random.normal(k, shape)).astype(jnp.float32)

    return {
        "conv1.weight": rnd(ks[0], (6, 3, 3, 3), 0.10),    # (Cout, Cin, KH, KW)
        "conv1.bias":   rnd(ks[1], (6,), 0.10),
        "conv2.weight": rnd(ks[2], (16, 6, 5, 5), 0.10),
        "conv2.bias":   rnd(ks[3], (16,), 0.10),
        "fc1.weight":   rnd(ks[4], (120, 400), 0.05),      # (out, in)
        "fc1.bias":     rnd(ks[5], (120,), 0.05),
        "bn1.weight":   jnp.ones((120,), jnp.float32),
        "bn1.bias":     jnp.zeros((120,), jnp.float32),
        "fc2.weight":   rnd(ks[6], (84, 120), 0.05),
        "fc2.bias":     rnd(ks[7], (84,), 0.05),
        "bn2.weight":   jnp.ones((84,), jnp.float32),
        "bn2.bias":     jnp.zeros((84,), jnp.float32),
        "fc3.weight":   rnd(ks[8], (6, 84), 0.05),
        "fc3.bias":     rnd(ks[9], (6,), 0.05),
    }


if __name__ == "__main__":
    key = jax.random.PRNGKey(0)
    pkey, xkey = jax.random.split(key)
    params = init_params(pkey)
    kparams = prepare_params(params)
    # 3x28x28 input: conv1(pad2,k3) -> 30 -> pool 15 -> conv2(k5) -> 11 -> pool 5
    # -> flatten 16*5*5 = 400, matching fc1's expected input size.
    x = jax.random.normal(xkey, (2, 3, 28, 28), jnp.float32)
    fwd = jax.jit(cnn_forward)
    out = jax.block_until_ready(fwd(x, kparams))
    assert out.shape == (2, 6), out.shape
    assert bool(jnp.all(jnp.isfinite(out)))
    print("KERNEL_OK")
</pallas_src>

<mosaic_0001>
module attributes {stable_mosaic.version = 11 : i64} {
  func.func @_cnn_fused_kernel(%arg0: memref<64x96xbf16, #tpu.memory_space<vmem>>, %arg1: memref<3x96x180xbf16, #tpu.memory_space<vmem>>, %arg2: memref<1x90xf32, #tpu.memory_space<vmem>>, %arg3: memref<5x90x160xbf16, #tpu.memory_space<vmem>>, %arg4: memref<1x80xf32, #tpu.memory_space<vmem>>, %arg5: memref<5x80x128xbf16, #tpu.memory_space<vmem>>, %arg6: memref<1x128xf32, #tpu.memory_space<vmem>>, %arg7: memref<1x128xf32, #tpu.memory_space<vmem>>, %arg8: memref<128x128xbf16, #tpu.memory_space<vmem>>, %arg9: memref<1x128xf32, #tpu.memory_space<vmem>>, %arg10: memref<1x128xf32, #tpu.memory_space<vmem>>, %arg11: memref<128x128xbf16, #tpu.memory_space<vmem>>, %arg12: memref<1x128xf32, #tpu.memory_space<vmem>>, %arg13: memref<2x35xf32, #tpu.memory_space<vmem>>, %arg14: memref<2x6xf32, #tpu.memory_space<vmem>>) attributes {dimension_semantics = [], scalar_prefetch = 0 : i64, scratch_operands = 0 : i64, tpu.core_type = #tpu.core_type<tc>} {
    %c0 = arith.constant 0 : index
    %c0_0 = arith.constant 0 : index
    %0 = vector.load %arg0[%c0, %c0_0] : memref<64x96xbf16, #tpu.memory_space<vmem>>, vector<64x96xbf16>
    %c0_1 = arith.constant 0 : index
    %c0_2 = arith.constant 0 : index
    %c0_3 = arith.constant 0 : index
    %1 = vector.load %arg1[%c0_1, %c0_2, %c0_3] : memref<3x96x180xbf16, #tpu.memory_space<vmem>>, vector<1x96x180xbf16>
    %2 = vector.shape_cast %1 : vector<1x96x180xbf16> to vector<96x180xbf16>
    %cst = arith.constant dense<0.000000e+00> : vector<64x180xf32>
    %3 = tpu.matmul %0, %2, %cst {dimension_numbers = #tpu.dot_dimension_numbers<[1], [0], [0], [1], [0, 0, 1, 1], [], []>} : vector<64x96xbf16>, vector<96x180xbf16>, vector<64x180xf32> -> vector<64x180xf32>
    %c1 = arith.constant 1 : index
    %c0_4 = arith.constant 0 : index
    %c0_5 = arith.constant 0 : index
    %4 = vector.load %arg1[%c1, %c0_4, %c0_5] : memref<3x96x180xbf16, #tpu.memory_space<vmem>>, vector<1x96x180xbf16>
    %5 = vector.shape_cast %4 : vector<1x96x180xbf16> to vector<96x180xbf16>
    %cst_6 = arith.constant dense<0.000000e+00> : vector<64x180xf32>
    %6 = tpu.matmul %0, %5, %cst_6 {dimension_numbers = #tpu.dot_dimension_numbers<[1], [0], [0], [1], [0, 0, 1, 1], [], []>} : vector<64x96xbf16>, vector<96x180xbf16>, vector<64x180xf32> -> vector<64x180xf32>
    %c2 = arith.constant 2 : index
    %c0_7 = arith.constant 0 : index
    %c0_8 = arith.constant 0 : index
    %7 = vector.load %arg1[%c2, %c0_7, %c0_8] : memref<3x96x180xbf16, #tpu.memory_space<vmem>>, vector<1x96x180xbf16>
    %8 = vector.shape_cast %7 : vector<1x96x180xbf16> to vector<96x180xbf16>
    %cst_9 = arith.constant dense<0.000000e+00> : vector<64x180xf32>
    %9 = tpu.matmul %0, %8, %cst_9 {dimension_numbers = #tpu.dot_dimension_numbers<[1], [0], [0], [1], [0, 0, 1, 1], [], []>} : vector<64x96xbf16>, vector<96x180xbf16>, vector<64x180xf32> -> vector<64x180xf32>
    %10 = vector.extract_strided_slice %3 {offsets = [0, 0], sizes = [62, 180], strides = [1, 1]} : vector<64x180xf32> to vector<62x180xf32>
    %11 = vector.extract_strided_slice %6 {offsets = [1, 0], sizes = [62, 180], strides = [1, 1]} : vector<64x180xf32> to vector<62x180xf32>
    %12 = arith.addf %10, %11 : vector<62x180xf32>
    %13 = vector.extract_strided_slice %9 {offsets = [2, 0], sizes = [62, 180], strides = [1, 1]} : vector<64x180xf32> to vector<62x180xf32>
    %14 = arith.addf %12, %13 : vector<62x180xf32>
    %15 = vector.extract_strided_slice %14 {offsets = [0, 0], sizes = [61, 180], strides = [1, 1]} : vector<62x180xf32> to vector<61x180xf32>
    %16 = vector.extract_strided_slice %14 {offsets = [1, 0], sizes = [61, 180], strides = [1, 1]} : vector<62x180xf32> to vector<61x180xf32>
    %17 = arith.maximumf %15, %16 : vector<61x180xf32>
    %18 = vector.extract_strided_slice %17 {offsets = [0, 0], sizes = [61, 90], strides = [1, 1]} : vector<61x180xf32> to vector<61x90xf32>
    %19 = vector.extract_strided_slice %17 {offsets = [0, 90], sizes = [61, 90], strides = [1, 1]} : vector<61x180xf32> to vector<61x90xf32>
    %20 = arith.maximumf %18, %19 : vector<61x90xf32>
    %c0_10 = arith.constant 0 : index
    %c0_11 = arith.constant 0 : index
    %21 = vector.load %arg2[%c0_10, %c0_11] : memref<1x90xf32, #tpu.memory_space<vmem>>, vector<1x90xf32>
    %22 = vector.broadcast %21 : vector<1x90xf32> to vector<61x90xf32>
    %23 = arith.addf %20, %22 : vector<61x90xf32>
    %cst_12 = arith.constant 0.000000e+00 : f32
    %24 = vector.broadcast %cst_12 : f32 to vector<61x90xf32>
    %25 = arith.maximumf %23, %24 : vector<61x90xf32>
    %26 = arith.truncf %25 : vector<61x90xf32> to vector<61x90xbf16>
    %c0_13 = arith.constant 0 : index
    %c0_14 = arith.constant 0 : index
    %c0_15 = arith.constant 0 : index
    %27 = vector.load %arg3[%c0_13, %c0_14, %c0_15] : memref<5x90x160xbf16, #tpu.memory_space<vmem>>, vector<1x90x160xbf16>
    %28 = vector.shape_cast %27 : vector<1x90x160xbf16> to vector<90x160xbf16>
    %cst_16 = arith.constant dense<0.000000e+00> : vector<61x160xf32>
    %29 = tpu.matmul %26, %28, %cst_16 {dimension_numbers = #tpu.dot_dimension_numbers<[1], [0], [0], [1], [0, 0, 1, 1], [], []>} : vector<61x90xbf16>, vector<90x160xbf16>, vector<61x160xf32> -> vector<61x160xf32>
    %c1_17 = arith.constant 1 : index
    %c0_18 = arith.constant 0 : index
    %c0_19 = arith.constant 0 : index
    %30 = vector.load %arg3[%c1_17, %c0_18, %c0_19] : memref<5x90x160xbf16, #tpu.memory_space<vmem>>, vector<1x90x160xbf16>
    %31 = vector.shape_cast %30 : vector<1x90x160xbf16> to vector<90x160xbf16>
    %cst_20 = arith.constant dense<0.000000e+00> : vector<61x160xf32>
    %32 = tpu.matmul %26, %31, %cst_20 {dimension_numbers = #tpu.dot_dimension_numbers<[1], [0], [0], [1], [0, 0, 1, 1], [], []>} : vector<61x90xbf16>, vector<90x160xbf16>, vector<61x160xf32> -> vector<61x160xf32>
    %c2_21 = arith.constant 2 : index
    %c0_22 = arith.constant 0 : index
    %c0_23 = arith.constant 0 : index
    %33 = vector.load %arg3[%c2_21, %c0_22, %c0_23] : memref<5x90x160xbf16, #tpu.memory_space<vmem>>, vector<1x90x160xbf16>
    %34 = vector.shape_cast %33 : vector<1x90x160xbf16> to vector<90x160xbf16>
    %cst_24 = arith.constant dense<0.000000e+00> : vector<61x160xf32>
    %35 = tpu.matmul %26, %34, %cst_24 {dimension_numbers = #tpu.dot_dimension_numbers<[1], [0], [0], [1], [0, 0, 1, 1], [], []>} : vector<61x90xbf16>, vector<90x160xbf16>, vector<61x160xf32> -> vector<61x160xf32>
    %c3 = arith.constant 3 : index
    %c0_25 = arith.constant 0 : index
    %c0_26 = arith.constant 0 : index
    %36 = vector.load %arg3[%c3, %c0_25, %c0_26] : memref<5x90x160xbf16, #tpu.memory_space<vmem>>, vector<1x90x160xbf16>
    %37 = vector.shape_cast %36 : vector<1x90x160xbf16> to vector<90x160xbf16>
    %cst_27 = arith.constant dense<0.000000e+00> : vector<61x160xf32>
    %38 = tpu.matmul %26, %37, %cst_27 {dimension_numbers = #tpu.dot_dimension_numbers<[1], [0], [0], [1], [0, 0, 1, 1], [], []>} : vector<61x90xbf16>, vector<90x160xbf16>, vector<61x160xf32> -> vector<61x160xf32>
    %c4 = arith.constant 4 : index
    %c0_28 = arith.constant 0 : index
    %c0_29 = arith.constant 0 : index
    %39 = vector.load %arg3[%c4, %c0_28, %c0_29] : memref<5x90x160xbf16, #tpu.memory_space<vmem>>, vector<1x90x160xbf16>
    %40 = vector.shape_cast %39 : vector<1x90x160xbf16> to vector<90x160xbf16>
    %cst_30 = arith.constant dense<0.000000e+00> : vector<61x160xf32>
    %41 = tpu.matmul %26, %40, %cst_30 {dimension_numbers = #tpu.dot_dimension_numbers<[1], [0], [0], [1], [0, 0, 1, 1], [], []>} : vector<61x90xbf16>, vector<90x160xbf16>, vector<61x160xf32> -> vector<61x160xf32>
    %42 = vector.extract_strided_slice %29 {offsets = [0, 0], sizes = [53, 160], strides = [1, 1]} : vector<61x160xf32> to vector<53x160xf32>
    %43 = vector.extract_strided_slice %32 {offsets = [2, 0], sizes = [53, 160], strides = [1, 1]} : vector<61x160xf32> to vector<53x160xf32>
    %44 = arith.addf %42, %43 : vector<53x160xf32>
    %45 = vector.extract_strided_slice %35 {offsets = [4, 0], sizes = [53, 160], strides = [1, 1]} : vector<61x160xf32> to vector<53x160xf32>
    %46 = arith.addf %44, %45 : vector<53x160xf32>
    %47 = vector.extract_strided_slice %38 {offsets = [6, 0], sizes = [53, 160], strides = [1, 1]} : vector<61x160xf32> to vector<53x160xf32>
    %48 = arith.addf %46, %47 : vector<53x160xf32>
    %49 = vector.extract_strided_slice %41 {offsets = [8, 0], sizes = [53, 160], strides = [1, 1]} : vector<61x160xf32> to vector<53x160xf32>
    %50 = arith.addf %48, %49 : vector<53x160xf32>
    %51 = vector.extract_strided_slice %50 {offsets = [0, 0], sizes = [51, 160], strides = [1, 1]} : vector<53x160xf32> to vector<51x160xf32>
    %52 = vector.extract_strided_slice %50 {offsets = [2, 0], sizes = [51, 160], strides = [1, 1]} : vector<53x160xf32> to vector<51x160xf32>
    %53 = arith.maximumf %51, %52 : vector<51x160xf32>
    %54 = vector.extract_strided_slice %53 {offsets = [0, 0], sizes = [51, 80], strides = [1, 1]} : vector<51x160xf32> to vector<51x80xf32>
    %55 = vector.extract_strided_slice %53 {offsets = [0, 80], sizes = [51, 80], strides = [1, 1]} : vector<51x160xf32> to vector<51x80xf32>
    %56 = arith.maximumf %54, %55 : vector<51x80xf32>
    %c0_31 = arith.constant 0 : index
    %c0_32 = arith.constant 0 : index
    %57 = vector.load %arg4[%c0_31, %c0_32] : memref<1x80xf32, #tpu.memory_space<vmem>>, vector<1x80xf32>
    %58 = vector.broadcast %57 : vector<1x80xf32> to vector<51x80xf32>
    %59 = arith.addf %56, %58 : vector<51x80xf32>
    %cst_33 = arith.constant 0.000000e+00 : f32
    %60 = vector.broadcast %cst_33 : f32 to vector<51x80xf32>
    %61 = arith.maximumf %59, %60 : vector<51x80xf32>
    %62 = arith.truncf %61 : vector<51x80xf32> to vector<51x80xbf16>
    %63 = vector.extract_strided_slice %62 {offsets = [0, 0], sizes = [35, 80], strides = [1, 1]} : vector<51x80xbf16> to vector<35x80xbf16>
    %c0_34 = arith.constant 0 : index
    %c0_35 = arith.constant 0 : index
    %c0_36 = arith.constant 0 : index
    %64 = vector.load %arg5[%c0_34, %c0_35, %c0_36] : memref<5x80x128xbf16, #tpu.memory_space<vmem>>, vector<1x80x128xbf16>
    %65 = vector.shape_cast %64 : vector<1x80x128xbf16> to vector<80x128xbf16>
    %cst_37 = arith.constant dense<0.000000e+00> : vector<35x128xf32>
    %66 = tpu.matmul %63, %65, %cst_37 {dimension_numbers = #tpu.dot_dimension_numbers<[1], [0], [0], [1], [0, 0, 1, 1], [], []>} : vector<35x80xbf16>, vector<80x128xbf16>, vector<35x128xf32> -> vector<35x128xf32>
    %67 = vector.extract_strided_slice %62 {offsets = [4, 0], sizes = [35, 80], strides = [1, 1]} : vector<51x80xbf16> to vector<35x80xbf16>
    %c1_38 = arith.constant 1 : index
    %c0_39 = arith.constant 0 : index
    %c0_40 = arith.constant 0 : index
    %68 = vector.load %arg5[%c1_38, %c0_39, %c0_40] : memref<5x80x128xbf16, #tpu.memory_space<vmem>>, vector<1x80x128xbf16>
    %69 = vector.shape_cast %68 : vector<1x80x128xbf16> to vector<80x128xbf16>
    %cst_41 = arith.constant dense<0.000000e+00> : vector<35x128xf32>
    %70 = tpu.matmul %67, %69, %cst_41 {dimension_numbers = #tpu.dot_dimension_numbers<[1], [0], [0], [1], [0, 0, 1, 1], [], []>} : vector<35x80xbf16>, vector<80x128xbf16>, vector<35x128xf32> -> vector<35x128xf32>
    %71 = arith.addf %66, %70 : vector<35x128xf32>
    %72 = vector.extract_strided_slice %62 {offsets = [8, 0], sizes = [35, 80], strides = [1, 1]} : vector<51x80xbf16> to vector<35x80xbf16>
    %c2_42 = arith.constant 2 : index
    %c0_43 = arith.constant 0 : index
    %c0_44 = arith.constant 0 : index
    %73 = vector.load %arg5[%c2_42, %c0_43, %c0_44] : memref<5x80x128xbf16, #tpu.memory_space<vmem>>, vector<1x80x128xbf16>
    %74 = vector.shape_cast %73 : vector<1x80x128xbf16> to vector<80x128xbf16>
    %cst_45 = arith.constant dense<0.000000e+00> : vector<35x128xf32>
    %75 = tpu.matmul %72, %74, %cst_45 {dimension_numbers = #tpu.dot_dimension_numbers<[1], [0], [0], [1], [0, 0, 1, 1], [], []>} : vector<35x80xbf16>, vector<80x128xbf16>, vector<35x128xf32> -> vector<35x128xf32>
    %76 = arith.addf %71, %75 : vector<35x128xf32>
    %77 = vector.extract_strided_slice %62 {offsets = [12, 0], sizes = [35, 80], strides = [1, 1]} : vector<51x80xbf16> to vector<35x80xbf16>
    %c3_46 = arith.constant 3 : index
    %c0_47 = arith.constant 0 : index
    %c0_48 = arith.constant 0 : index
    %78 = vector.load %arg5[%c3_46, %c0_47, %c0_48] : memref<5x80x128xbf16, #tpu.memory_space<vmem>>, vector<1x80x128xbf16>
    %79 = vector.shape_cast %78 : vector<1x80x128xbf16> to vector<80x128xbf16>
    %cst_49 = arith.constant dense<0.000000e+00> : vector<35x128xf32>
    %80 = tpu.matmul %77, %79, %cst_49 {dimension_numbers = #tpu.dot_dimension_numbers<[1], [0], [0], [1], [0, 0, 1, 1], [], []>} : vector<35x80xbf16>, vector<80x128xbf16>, vector<35x128xf32> -> vector<35x128xf32>
    %81 = arith.addf %76, %80 : vector<35x128xf32>
    %82 = vector.extract_strided_slice %62 {offsets = [16, 0], sizes = [35, 80], strides = [1, 1]} : vector<51x80xbf16> to vector<35x80xbf16>
    %c4_50 = arith.constant 4 : index
    %c0_51 = arith.constant 0 : index
    %c0_52 = arith.constant 0 : index
    %83 = vector.load %arg5[%c4_50, %c0_51, %c0_52] : memref<5x80x128xbf16, #tpu.memory_space<vmem>>, vector<1x80x128xbf16>
    %84 = vector.shape_cast %83 : vector<1x80x128xbf16> to vector<80x128xbf16>
    %cst_53 = arith.constant dense<0.000000e+00> : vector<35x128xf32>
    %85 = tpu.matmul %82, %84, %cst_53 {dimension_numbers = #tpu.dot_dimension_numbers<[1], [0], [0], [1], [0, 0, 1, 1], [], []>} : vector<35x80xbf16>, vector<80x128xbf16>, vector<35x128xf32> -> vector<35x128xf32>
    %86 = arith.addf %81, %85 : vector<35x128xf32>
    %c0_54 = arith.constant 0 : index
    %c0_55 = arith.constant 0 : index
    %87 = vector.load %arg13[%c0_54, %c0_55] : memref<2x35xf32, #tpu.memory_space<vmem>>, vector<2x35xf32>
    %cst_56 = arith.constant dense<0.000000e+00> : vector<2x128xf32>
    %88 = tpu.matmul %87, %86, %cst_56 {dimension_numbers = #tpu.dot_dimension_numbers<[1], [0], [0], [1], [0, 0, 1, 1], [], []>} : vector<2x35xf32>, vector<35x128xf32>, vector<2x128xf32> -> vector<2x128xf32>
    %c0_57 = arith.constant 0 : index
    %c0_58 = arith.constant 0 : index
    %89 = vector.load %arg6[%c0_57, %c0_58] : memref<1x128xf32, #tpu.memory_space<vmem>>, vector<1x128xf32>
    %c0_59 = arith.constant 0 : index
    %c0_60 = arith.constant 0 : index
    %90 = vector.load %arg7[%c0_59, %c0_60] : memref<1x128xf32, #tpu.memory_space<vmem>>, vector<1x128xf32>
    %cst_61 = arith.constant dense<0.000000e+00> : vector<128xf32>
    %91 = vector.multi_reduction <add>, %88, %cst_61 [0] : vector<2x128xf32> to vector<128xf32>
    %92 = vector.shape_cast %91 : vector<128xf32> to vector<1x128xf32>
    %cst_62 = arith.constant 2.000000e+00 : f32
    %93 = vector.broadcast %cst_62 : f32 to vector<1x128xf32>
    %94 = arith.divf %92, %93 : vector<1x128xf32>
    %95 = vector.broadcast %94 : vector<1x128xf32> to vector<2x128xf32>
    %96 = arith.subf %88, %95 : vector<2x128xf32>
    %97 = vector.broadcast %94 : vector<1x128xf32> to vector<2x128xf32>
    %98 = arith.subf %88, %97 : vector<2x128xf32>
    %99 = arith.mulf %96, %98 : vector<2x128xf32>
    %cst_63 = arith.constant dense<0.000000e+00> : vector<128xf32>
    %100 = vector.multi_reduction <add>, %99, %cst_63 [0] : vector<2x128xf32> to vector<128xf32>
    %101 = vector.shape_cast %100 : vector<128xf32> to vector<1x128xf32>
    %cst_64 = arith.constant 2.000000e+00 : f32
    %102 = vector.broadcast %cst_64 : f32 to vector<1x128xf32>
    %103 = arith.divf %101, %102 : vector<1x128xf32>
    %104 = vector.broadcast %94 : vector<1x128xf32> to vector<2x128xf32>
    %105 = arith.subf %88, %104 : vector<2x128xf32>
    %cst_65 = arith.constant 9.99999974E-6 : f32
    %106 = vector.broadcast %cst_65 : f32 to vector<1x128xf32>
    %107 = arith.addf %103, %106 : vector<1x128xf32>
    %108 = math.rsqrt %107 : vector<1x128xf32>
    %109 = vector.broadcast %108 : vector<1x128xf32> to vector<2x128xf32>
    %110 = arith.mulf %105, %109 : vector<2x128xf32>
    %111 = vector.broadcast %89 : vector<1x128xf32> to vector<2x128xf32>
    %112 = arith.mulf %110, %111 : vector<2x128xf32>
    %113 = vector.broadcast %90 : vector<1x128xf32> to vector<2x128xf32>
    %114 = arith.addf %112, %113 : vector<2x128xf32>
    %cst_66 = arith.constant 0.000000e+00 : f32
    %115 = vector.broadcast %cst_66 : f32 to vector<2x128xf32>
    %116 = arith.maximumf %114, %115 : vector<2x128xf32>
    %117 = arith.truncf %116 : vector<2x128xf32> to vector<2x128xbf16>
    %c0_67 = arith.constant 0 : index
    %c0_68 = arith.constant 0 : index
    %118 = vector.load %arg8[%c0_67, %c0_68] : memref<128x128xbf16, #tpu.memory_space<vmem>>, vector<128x128xbf16>
    %cst_69 = arith.constant dense<0.000000e+00> : vector<2x128xf32>
    %119 = tpu.matmul %117, %118, %cst_69 {dimension_numbers = #tpu.dot_dimension_numbers<[1], [0], [0], [1], [0, 0, 1, 1], [], []>} : vector<2x128xbf16>, vector<128x128xbf16>, vector<2x128xf32> -> vector<2x128xf32>
    %c0_70 = arith.constant 0 : index
    %c0_71 = arith.constant 0 : index
    %120 = vector.load %arg9[%c0_70, %c0_71] : memref<1x128xf32, #tpu.memory_space<vmem>>, vector<1x128xf32>
    %c0_72 = arith.constant 0 : index
    %c0_73 = arith.constant 0 : index
    %121 = vector.load %arg10[%c0_72, %c0_73] : memref<1x128xf32, #tpu.memory_space<vmem>>, vector<1x128xf32>
    %cst_74 = arith.constant dense<0.000000e+00> : vector<128xf32>
    %122 = vector.multi_reduction <add>, %119, %cst_74 [0] : vector<2x128xf32> to vector<128xf32>
    %123 = vector.shape_cast %122 : vector<128xf32> to vector<1x128xf32>
    %cst_75 = arith.constant 2.000000e+00 : f32
    %124 = vector.broadcast %cst_75 : f32 to vector<1x128xf32>
    %125 = arith.divf %123, %124 : vector<1x128xf32>
    %126 = vector.broadcast %125 : vector<1x128xf32> to vector<2x128xf32>
    %127 = arith.subf %119, %126 : vector<2x128xf32>
    %128 = vector.broadcast %125 : vector<1x128xf32> to vector<2x128xf32>
    %129 = arith.subf %119, %128 : vector<2x128xf32>
    %130 = arith.mulf %127, %129 : vector<2x128xf32>
    %cst_76 = arith.constant dense<0.000000e+00> : vector<128xf32>
    %131 = vector.multi_reduction <add>, %130, %cst_76 [0] : vector<2x128xf32> to vector<128xf32>
    %132 = vector.shape_cast %131 : vector<128xf32> to vector<1x128xf32>
    %cst_77 = arith.constant 2.000000e+00 : f32
    %133 = vector.broadcast %cst_77 : f32 to vector<1x128xf32>
    %134 = arith.divf %132, %133 : vector<1x128xf32>
    %135 = vector.broadcast %125 : vector<1x128xf32> to vector<2x128xf32>
    %136 = arith.subf %119, %135 : vector<2x128xf32>
    %cst_78 = arith.constant 9.99999974E-6 : f32
    %137 = vector.broadcast %cst_78 : f32 to vector<1x128xf32>
    %138 = arith.addf %134, %137 : vector<1x128xf32>
    %139 = math.rsqrt %138 : vector<1x128xf32>
    %140 = vector.broadcast %139 : vector<1x128xf32> to vector<2x128xf32>
    %141 = arith.mulf %136, %140 : vector<2x128xf32>
    %142 = vector.broadcast %120 : vector<1x128xf32> to vector<2x128xf32>
    %143 = arith.mulf %141, %142 : vector<2x128xf32>
    %144 = vector.broadcast %121 : vector<1x128xf32> to vector<2x128xf32>
    %145 = arith.addf %143, %144 : vector<2x128xf32>
    %cst_79 = arith.constant 0.000000e+00 : f32
    %146 = vector.broadcast %cst_79 : f32 to vector<2x128xf32>
    %147 = arith.maximumf %145, %146 : vector<2x128xf32>
    %148 = arith.truncf %147 : vector<2x128xf32> to vector<2x128xbf16>
    %c0_80 = arith.constant 0 : index
    %c0_81 = arith.constant 0 : index
    %149 = vector.load %arg11[%c0_80, %c0_81] : memref<128x128xbf16, #tpu.memory_space<vmem>>, vector<128x128xbf16>
    %cst_82 = arith.constant dense<0.000000e+00> : vector<2x128xf32>
    %150 = tpu.matmul %148, %149, %cst_82 {dimension_numbers = #tpu.dot_dimension_numbers<[1], [0], [0], [1], [0, 0, 1, 1], [], []>} : vector<2x128xbf16>, vector<128x128xbf16>, vector<2x128xf32> -> vector<2x128xf32>
    %c0_83 = arith.constant 0 : index
    %c0_84 = arith.constant 0 : index
    %151 = vector.load %arg12[%c0_83, %c0_84] : memref<1x128xf32, #tpu.memory_space<vmem>>, vector<1x128xf32>
    %152 = vector.broadcast %151 : vector<1x128xf32> to vector<2x128xf32>
    %153 = arith.addf %150, %152 : vector<2x128xf32>
    %154 = vector.extract_strided_slice %153 {offsets = [0, 0], sizes = [2, 6], strides = [1, 1]} : vector<2x128xf32> to vector<2x6xf32>
    %c0_85 = arith.constant 0 : index
    %c0_86 = arith.constant 0 : index
    %155 = vector.load %arg14[%c0_85, %c0_86] : memref<2x6xf32, #tpu.memory_space<vmem>>, vector<2x6xf32>
    tpu.vector_store %arg14[%c0_85, %c0_86], %154 {strides = array<i32>} : memref<2x6xf32, #tpu.memory_space<vmem>>, vector<2x6xf32>,
    return
  }
}

</mosaic_0001>

<bundles_post_ra>
// kernel: cnn_forward.1
= control target key start
LH: loop header
LB: loop body
LE: loop exit
PB: predicated region body
PF: predicated region fallthrough
CT: control target
= control target key end

     0   :  { %v3720_v2 = vmov 0   ;;  %vm149_vm0 = vcmask 785408   ;;  %s5007_s0 = inlined_call_operand.vmem [shape: bf16[64,96], index: 0, kind: input, shape index: {}]   ;;  %s5008_s1 = inlined_call_operand.vmem [shape: bf16[3,96,180], index: 1, kind: input, shape index: {}]   ;;  %s5009_s2 = inlined_call_operand.vmem [shape: f32[1,90], index: 2, kind: input, shape index: {}]   ;;  %s5010_s3 = inlined_call_operand.vmem [shape: bf16[5,90,160], index: 3, kind: input, shape index: {}]   ;;  %s5011_s4 = inlined_call_operand.vmem [shape: f32[1,80], index: 4, kind: input, shape index: {}]   ;;  %s5012_s5 = inlined_call_operand.vmem [shape: bf16[5,80,128], index: 5, kind: input, shape index: {}]   ;;  %s5013_s6 = inlined_call_operand.vmem [shape: f32[1,128], index: 6, kind: input, shape index: {}]   ;;  %s5014_s7 = inlined_call_operand.vmem [shape: f32[1,128], index: 7, kind: input, shape index: {}]   ;;  %s5015_s8 = inlined_call_operand.vmem [shape: bf16[128,128], index: 8, kind: input, shape index: {}]   ;;  %s5016_s9 = inlined_call_operand.vmem [shape: f32[1,128], index: 9, kind: input, shape index: {}]   ;;  %s5017_s10 = inlined_call_operand.vmem [shape: f32[1,128], index: 10, kind: input, shape index: {}]   ;;  %s5018_s11 = inlined_call_operand.vmem [shape: bf16[128,128], index: 11, kind: input, shape index: {}]   ;;  %s5019_s12 = inlined_call_operand.vmem [shape: f32[1,128], index: 12, kind: input, shape index: {}]   ;;  %s5020_s13 = inlined_call_operand.vmem [shape: f32[2,35], index: 13, kind: input, shape index: {}]   ;;  %s5021_s14 = inlined_call_operand.hbm [shape: f32[2,6], index: 14, kind: output, shape index: {}]  }
   0x1   :  { %v3505_v0 = vld [vmem:[%s5008_s1 + $0x54] ss:$8 sps:$4 sm:$0xff]   ;;  %194 = vmatprep.mubr.bf16.mxu0 %v3720_v2  ;;  %340 = vmatprep.mubr.bf16.mxu1 %v3720_v2  ;;  %v3509_v3 = vld [vmem:[%s5008_s1 + $0x50] ss:$8 sps:$4 sm:$0xff]   ;;  %v3511_v5 = vld [vmem:[%s5008_s1 + $0x44] ss:$8 sps:$4 sm:$0xff]  }
   0x2   :  { %v3507_v1 = vld [vmem:[%s5008_s1 + $0xb4] ss:$8 sps:$4 sm:$0xff]   ;;  %166 = vmatprep.subr.bf16.mxu0 %v3505_v0  ;;  %v3510_v4 = vld [vmem:[%s5008_s1 + $0xb0] ss:$8 sps:$4 sm:$0xff]   ;;  %v3513_v6 = vld [vmem:[%s5008_s1 + $0xa4] ss:$8 sps:$4 sm:$0xff]  }
   0x3   :  { %312 = vmatprep.subr.bf16.mxu1 %v3507_v1  ;;  %167 = vmatpush1.bf16.msra.mxu0 %v3509_v3  ;;  %v3515_v7 = vld [vmem:[%s5008_s1 + $0x40] ss:$8 sps:$4 sm:$0xff]   ;;  %v3517_v9 = vld [vmem:[%s5008_s1 + $0x34] ss:$8 sps:$4 sm:$0xff]   ;;  %v3521_v11 = vld [vmem:[%s5008_s1 + $0x30] ss:$8 sps:$4 sm:$0xff]  }
   0x4   :  { %313 = vmatpush1.bf16.msra.mxu1 %v3510_v4  ;;  %168 = vmatprep.subr.bf16.mxu0 %v3511_v5  ;;  %v3516_v8 = vld [vmem:[%s5008_s1 + $0xa0] ss:$8 sps:$4 sm:$0xff]   ;;  %v3519_v10 = vld [vmem:[%s5008_s1 + $0x94] ss:$8 sps:$4 sm:$0xff]   ;;  %v3522_v12 = vld [vmem:[%s5008_s1 + $0x90] ss:$8 sps:$4 sm:$0xff]  }
   0x5   :  { %314 = vmatprep.subr.bf16.mxu1 %v3513_v6  ;;  %v3523_v13 = vld [vmem:[%s5008_s1 + $0x24] ss:$8 sps:$4 sm:$0xff]   ;;  %v3527_v15 = vld [vmem:[%s5008_s1 + $0x20] ss:$8 sps:$4 sm:$0xff]   ;;  %v3529_v17 = vld [vmem:[%s5008_s1 + $0x14] ss:$8 sps:$4 sm:$0xff]  }
   0x6   :  { %v3525_v14 = vld [vmem:[%s5008_s1 + $0x84] ss:$8 sps:$4 sm:$0xff]   ;;  %v3528_v16 = vld [vmem:[%s5008_s1 + $0x80] ss:$8 sps:$4 sm:$0xff]   ;;  %v3531_v18 = vld [vmem:[%s5008_s1 + $0x74] ss:$8 sps:$4 sm:$0xff]  }
   0x7   :  { %169 = vmatpush1.bf16.msra.mxu0 %v3515_v7  ;;  %v3533_v19 = vld [vmem:[%s5008_s1 + $0x10] ss:$8 sps:$4 sm:$0xff]   ;;  %v3535_v21 = vld [vmem:[%s5008_s1 + $0x4] ss:$8 sps:$4 sm:$0xff]   ;;  %v3539_v23 = vld [vmem:[%s5008_s1] ss:$8 sps:$4 sm:$0xff]  }
   0x8   :  { %315 = vmatpush1.bf16.msra.mxu1 %v3516_v8  ;;  %170 = vmatprep.subr.bf16.mxu0 %v3517_v9  ;;  %v3534_v20 = vld [vmem:[%s5008_s1 + $0x70] ss:$8 sps:$4 sm:$0xff]   ;;  %v3537_v22 = vld [vmem:[%s5008_s1 + $0x64] ss:$8 sps:$4 sm:$0xff]   ;;  %v3540_v24 = vld [vmem:[%s5008_s1 + $0x60] ss:$8 sps:$4 sm:$0xff]  }
   0x9   :  { %316 = vmatprep.subr.bf16.mxu1 %v3519_v10  ;;  %v3545_v25 = vld [vmem:[%s5008_s1 + $0x114] ss:$8 sps:$4 sm:$0xff]   ;;  %v3541_v26 = vld [vmem:[%s5007_s0] sm:$0xff]   ;;  %v3543_v27 = vld [vmem:[%s5008_s1 + $0x110] ss:$8 sps:$4 sm:$0xff]  }
   0xa   :  { %v3548_v28 = vld [vmem:[%s5008_s1 + $0x104] ss:$8 sps:$4 sm:$0xff]   ;;  %v3546_v29 = vld [vmem:[%s5008_s1 + $0x100] ss:$8 sps:$4 sm:$0xff]   ;;  %v3552_v30 = vld [vmem:[%s5008_s1 + $0xf4] ss:$8 sps:$4 sm:$0xff]  }
   0xb   :  { %171 = vmatpush1.bf16.msra.mxu0 %v3521_v11  ;;  %v3542_v31 = vld [vmem:[%s5007_s0 + $0x8] sm:$0xff]   ;;  %v3550_v32 = vld [vmem:[%s5008_s1 + $0xf0] ss:$8 sps:$4 sm:$0xff]   ;;  %v3559_v35 = vld [vmem:[%s5008_s1 + $0xd4] ss:$8 sps:$4 sm:$0xff]  }
   0xc   :  { %317 = vmatpush1.bf16.msra.mxu1 %v3522_v12  ;;  %172 = vmatprep.subr.bf16.mxu0 %v3523_v13  ;;  %v3555_v33 = vld [vmem:[%s5008_s1 + $0xe4] ss:$8 sps:$4 sm:$0xff]   ;;  %v3553_v34 = vld [vmem:[%s5008_s1 + $0xe0] ss:$8 sps:$4 sm:$0xff]   ;;  %v3549_v36 = vld [vmem:[%s5007_s0 + $0x10] sm:$0xff]  }
   0xd   :  { %318 = vmatprep.subr.bf16.mxu1 %v3525_v14  ;;  %v3557_v37 = vld [vmem:[%s5008_s1 + $0xd0] ss:$8 sps:$4 sm:$0xff]   ;;  %v3562_v38 = vld [vmem:[%s5008_s1 + $0xc4] ss:$8 sps:$4 sm:$0xff]   ;;  %v3560_v39 = vld [vmem:[%s5008_s1 + $0xc0] ss:$8 sps:$4 sm:$0xff]  }
   0xe   :  { %v3556_v40 = vld [vmem:[%s5007_s0 + $0x18] sm:$0xff]  }
   0xf   :  { %173 = vmatpush1.bf16.msra.mxu0 %v3527_v15 }
  0x10   :  { %319 = vmatpush1.bf16.msra.mxu1 %v3528_v16  ;;  %174 = vmatprep.subr.bf16.mxu0 %v3529_v17 }
  0x11   :  { %320 = vmatprep.subr.bf16.mxu1 %v3531_v18 }
  0x13   :  { %175 = vmatpush1.bf16.msra.mxu0 %v3533_v19 }
  0x14   :  { %321 = vmatpush1.bf16.msra.mxu1 %v3534_v20  ;;  %176 = vmatprep.subr.bf16.mxu0 %v3535_v21 }
  0x15   :  { %322 = vmatprep.subr.bf16.mxu1 %v3537_v22 }
  0x17   :  { %177 = vmatpush1.bf16.msra.mxu0 %v3539_v23 }
  0x18   :  { %323 = vmatpush1.bf16.msra.mxu1 %v3540_v24  ;;  %458 = vmatprep.subr.bf16.mxu0 %v3545_v25 }
  0x1a   :  { %2974 = vmatmul.mubr.msk.bf16.vlgmr.msra.gmra.mxu0 %vm149_vm0, %v3541_v26 }
  0x1b   :  { %3002 = vmatmul.mubr.msk.bf16.vlgmr.msra.gmra.mxu1 %vm149_vm0, %v3541_v26  ;;  %204 = vmatprep.mubr.bf16.mxu0 %v3720_v2 }
  0x1c   :  { %350 = vmatprep.mubr.bf16.mxu1 %v3720_v2  ;;  %459 = vmatpush1.bf16.msra.mxu0 %v3543_v27 }
  0x1d   :  { %460 = vmatprep.subr.bf16.mxu0 %v3548_v28 }
  0x20   :  { %461 = vmatpush1.bf16.msra.mxu0 %v3546_v29 }
  0x21   :  { %462 = vmatprep.subr.bf16.mxu0 %v3552_v30 }
  0x22   :  { %2975 = vmatmul.mubr.msk.bf16.gmra.mxu0 %vm149_vm0, %v3542_v31 }
  0x23   :  { %3003 = vmatmul.mubr.msk.bf16.gmra.mxu1 %vm149_vm0, %v3542_v31  ;;  %214 = vmatprep.mubr.bf16.mxu0 %v3720_v2 }
  0x24   :  { %360 = vmatprep.mubr.bf16.mxu1 %v3720_v2  ;;  %463 = vmatpush1.bf16.msra.mxu0 %v3550_v32 }
  0x25   :  { %464 = vmatprep.subr.bf16.mxu0 %v3555_v33 }
  0x28   :  { %465 = vmatpush1.bf16.msra.mxu0 %v3553_v34 }
  0x29   :  { %466 = vmatprep.subr.bf16.mxu0 %v3559_v35 }
  0x2a   :  { %2976 = vmatmul.mubr.msk.bf16.gmra.mxu0 %vm149_vm0, %v3549_v36 }
  0x2b   :  { %3004 = vmatmul.mubr.msk.bf16.gmra.mxu1 %vm149_vm0, %v3549_v36  ;;  %224 = vmatprep.mubr.bf16.mxu0 %v3720_v2 }
  0x2c   :  { %370 = vmatprep.mubr.bf16.mxu1 %v3720_v2  ;;  %467 = vmatpush1.bf16.msra.mxu0 %v3557_v37 }
  0x2d   :  { %468 = vmatprep.subr.bf16.mxu0 %v3562_v38 }
  0x30   :  { %469 = vmatpush1.bf16.msra.mxu0 %v3560_v39 }
  0x32   :  { %2977 = vmatmul.mubr.msk.bf16.gmra.mxu0 %vm149_vm0, %v3556_v40 }
  0x33   :  { %3005 = vmatmul.mubr.msk.bf16.gmra.mxu1 %vm149_vm0, %v3556_v40  ;;  %486 = vmatprep.mubr.bf16.mxu0 %v3720_v2 }
  0x34   :  { %985 = vmatprep.mubr.bf16.mxu1 %v3720_v2 }
  0x3a   :  { %3030 = vmatmul.mubr.msk.bf16.vlgmr.msra.gmra.mxu0 %vm149_vm0, %v3541_v26 }
  0x3b   :  { %496 = vmatprep.mubr.bf16.mxu0 %v3720_v2 }
  0x42   :  { %3031 = vmatmul.mubr.msk.bf16.gmra.mxu0 %vm149_vm0, %v3542_v31 }
  0x43   :  { %506 = vmatprep.mubr.bf16.mxu0 %v3720_v2 }
  0x4a   :  { %3032 = vmatmul.mubr.msk.bf16.gmra.mxu0 %vm149_vm0, %v3549_v36 }
  0x4b   :  { %19 = vsyncpa [#allocation3], 0  ;;  %516 = vmatprep.mubr.bf16.mxu0 %v3720_v2  ;;  %v3563_v41 = vld [vmem:[%s5010_s3 + $0x54] ss:$8 sps:$4 sm:$0x1f]   ;;  %vm946_vm1 = vcmask 1044480  }
  0x4c   :  { %v3565_v42 = vld [vmem:[%s5010_s3 + $0xb4] ss:$8 sps:$4 sm:$0x1f]   ;;  %v3567_v43 = vld [vmem:[%s5010_s3 + $0x50] ss:$8 sps:$4 sm:$0x1f]   ;;  %3047 = vmatprep.subr.msk.bf16.mxu1 %vm946_vm1, %v3563_v41 }
  0x4d   :  { %v3568_v44 = vld [vmem:[%s5010_s3 + $0xb0] ss:$8 sps:$4 sm:$0x1f]   ;;  %v3571_v45 = vld [vmem:[%s5010_s3 + $0x44] ss:$8 sps:$4 sm:$0xff]   ;;  %3076 = vmatprep.subr.msk.bf16.mxu0 %vm946_vm1, %v3565_v42  ;;  %v948_v46 = vsel %vm946_vm1, %v3567_v43, 0 }
  0x4e   :  { %v3574_v47 = vld [vmem:[%s5010_s3 + $0xa4] ss:$8 sps:$4 sm:$0xff]   ;;  %958 = vmatpush1.bf16.msra.mxu1 %v948_v46  ;;  %v1096_v48 = vsel %vm946_vm1, %v3568_v44, 0  ;;  %v3569_v49 = vld [vmem:[%s5010_s3 + $0x40] ss:$8 sps:$4 sm:$0xff]   ;;  %vm543_vm2 = vcmask 1046528  }
  0x4f   :  { %1106 = vmatpush1.bf16.msra.mxu0 %v1096_v48  ;;  %959 = vmatprep.subr.bf16.mxu1 %v3571_v45  ;;  %v3572_v50 = vld [vmem:[%s5010_s3 + $0xa0] ss:$8 sps:$4 sm:$0xff]   ;;  %vm622_vm3 = vcmask 1045504   ;;  %v3575_v31 = vld [vmem:[%s5010_s3 + $0x30] ss:$8 sps:$4 sm:$0xff]   ;;  %s3721_s23 = smov 38  }
  0x50   :  { %1107 = vmatprep.subr.bf16.mxu0 %v3574_v47  ;;  %v3577_v32 = vld [vmem:[%s5010_s3 + $0x34] ss:$8 sps:$4 sm:$0xff]   ;;  %v3578_v37 = vld [vmem:[%s5010_s3 + $0x90] ss:$8 sps:$4 sm:$0xff]   ;;  %vm811_vm4 = vcmask 310272   ;;  %vm933_vm5 = vcmask 736256  }
  0x51   :  { %v3580_v38 = vld [vmem:[%s5010_s3 + $0x94] ss:$8 sps:$4 sm:$0xff]   ;;  %vm1704_vm6 = vcmask 1043456   ;;  %vm1779_vm7 = vcmask 1041408   ;;  %s3723_s16 = smov 48   ;;  %vm3724_vm8 = vmmov 0  }
  0x52   :  { %3033 = vmatmul.mubr.msk.bf16.gmra.mxu0 %vm149_vm0, %v3556_v40  ;;  %960 = vmatpush1.bf16.msra.mxu1 %v3569_v49  ;;  %vm1962_vm9 = vcmask 392192   ;;  %vm2069_vm10 = vcmask 654336   ;;  %vm2574_vm11 = vcmask 1042432   ;;  %vm2570_vm12 = vcmask 285696   ;;  %s3725_s26 = smov [#allocation2]  }
  0x53   :  { %1133 = vmatprep.mubr.bf16.mxu0 %v3720_v2  ;;  %1108 = vmatpush1.bf16.msra.mxu0 %v3572_v50  ;;  %vm2942_vm13 = vcmask 41984  }
  0x54   :  { %961 = vmatprep.subr.bf16.mxu1 %v3577_v32  ;;  %1109 = vmatprep.subr.bf16.mxu0 %v3580_v38 }
  0x56   :  { %962 = vmatpush1.bf16.msra.mxu1 %v3575_v31 }
  0x57   :  { %1110 = vmatpush1.bf16.msra.mxu0 %v3578_v37 }
  0xda   :  { %v196_v51 = vpop.f32.mrf.mxu0 }
  0xdb   :  { %v342_v52 = vpop.f32.mrf.mxu1 }
  0xdc   :  { %v198_v53 = vpop.f32.mrf.mxu0  ;;  %v544_v15 = vrot.slane %v342_v52, 1  ;;  %v3583_v52 = vld [vmem:[%s5010_s3 + $0x24] ss:$8 sps:$4 sm:$0xff]  }
  0xdd   :  { %v344_v54 = vpop.f32.mrf.mxu1  ;;  %963 = vmatprep.subr.bf16.mxu1 %v3583_v52  ;;  %v3593_v52 = vld [vmem:[%s5010_s3] ss:$8 sps:$4 sm:$0xff]  }
  0xde   :  { %v3975_v55 = vpop.f32.mrf.mxu0  ;;  %v547_v16 = vrot.slane %v344_v54, 1 }
  0xdf   :  { %v346_v56 = vpop.f32.mrf.mxu1 }
  0xe0   :  { %v3977_v57 = vpop.f32.mrf.mxu0  ;;  %v545_v17 = vrot.slane %v346_v56, 1 }
  0xe1   :  { %v348_v58 = vpop.f32.mrf.mxu1 }
  0xe2   :  { %v3979_v59 = vpop.f32.mrf.mxu0  ;;  %v548_v18 = vrot.slane %v348_v58, 1  ;;  %v546_v26 = vsel %vm543_vm2, %v544_v15, %v545_v17 }
  0xe3   :  { %v352_v60 = vpop.f32.mrf.mxu1  ;;  %v590_v45 = vadd.f32 %v546_v26, %v196_v51  ;;  %v3586_v51 = vld [vmem:[%s5010_s3 + $0x84] ss:$8 sps:$4 sm:$0xff]  }
  0xe4   :  { %v3981_v61 = vpop.f32.mrf.mxu0  ;;  %v550_v20 = vrot.slane %v352_v60, 1  ;;  %v549_v27 = vsel %vm543_vm2, %v547_v16, %v548_v18  ;;  %1111 = vmatprep.subr.bf16.mxu0 %v3586_v51  ;;  %v3596_v51 = vld [vmem:[%s5010_s3 + $0x60] ss:$8 sps:$4 sm:$0xff]  }
  0xe5   :  { %v354_v63 = vpop.f32.mrf.mxu1  ;;  %v591_v43 = vadd.f32 %v549_v27, %v198_v53 }
  0xe6   :  { %v3983_v62 = vpop.f32.mrf.mxu0  ;;  %v552_v21 = vrot.slane %v354_v63, 1  ;;  %v551_v33 = vsel %vm543_vm2, %v545_v17, %v550_v20  ;;  %v3581_v63 = vld [vmem:[%s5010_s3 + $0x20] ss:$8 sps:$4 sm:$0xff]  }
  0xe7   :  { %v356_v3 = vpop.f32.mrf.mxu1  ;;  %v592_v53 = vadd.f32 %v551_v33, %v3975_v55  ;;  %964 = vmatpush1.bf16.msra.mxu1 %v3581_v63 }
  0xe8   :  { %v3985_v0 = vpop.f32.mrf.mxu0  ;;  %v554_v23 = vrot.slane %v356_v3, 1  ;;  %v553_v34 = vsel %vm543_vm2, %v548_v18, %v552_v21  ;;  %v3584_v3 = vld [vmem:[%s5010_s3 + $0x80] ss:$8 sps:$4 sm:$0xff]  }
  0xe9   :  { %v358_v6 = vpop.f32.mrf.mxu1  ;;  %v593_v54 = vadd.f32 %v553_v34, %v3977_v57  ;;  %1112 = vmatpush1.bf16.msra.mxu0 %v3584_v3 }
  0xea   :  { %v3987_v1 = vpop.f32.mrf.mxu0  ;;  %v556_v24 = vrot.slane %v358_v6, 1  ;;  %v555_v46 = vsel %vm543_vm2, %v550_v20, %v554_v23 }
  0xeb   :  { %v3997_v9 = vpop.f32.mrf.mxu1 }
  0xec   :  { %v3989_v4 = vpop.f32.mrf.mxu0  ;;  %v558_v35 = vrot.slane %v3997_v9, 1  ;;  %v557_v47 = vsel %vm543_vm2, %v552_v21, %v556_v24 }
  0xed   :  { %v4003_v12 = vpop.f32.mrf.mxu1  ;;  %v595_v15 = vadd.f32 %v557_v47, %v3981_v61  ;;  %v3592_v61 = vld [vmem:[%s5010_s3 + $0x74] ss:$8 sps:$4 sm:$0xff]  }
  0xee   :  { %v3991_v5 = vpop.f32.mrf.mxu0  ;;  %v560_v39 = vrot.slane %v4003_v12, 1  ;;  %v559_v56 = vsel %vm543_vm2, %v554_v23, %v558_v35  ;;  %1113 = vmatprep.subr.bf16.mxu0 %v3592_v61 }
  0xef   :  { %v4007_v19 = vpop.f32.mrf.mxu1  ;;  %v596_v20 = vadd.f32 %v559_v56, %v3983_v62 }
  0xf0   :  { %v3993_v7 = vpop.f32.mrf.mxu0  ;;  %v561_v6 = vsel %vm543_vm2, %v556_v24, %v560_v39  ;;  %v562_v55 = vrot.slane %v4007_v19, 1 }
  0xf1   :  { %v4011_v28 = vpop.f32.mrf.mxu1  ;;  %v597_v24 = vadd.f32 %v561_v6, %v3985_v0 }
  0xf2   :  { %v3995_v8 = vpop.f32.mrf.mxu0  ;;  %v564_v21 = vrot.slane %v4011_v28, 1  ;;  %v563_v31 = vsel %vm543_vm2, %v558_v35, %v562_v55 }
  0xf3   :  { %v4032_v48 = vpop.f32.mrf.mxu1  ;;  %v598_v47 = vadd.f32 %v563_v31, %v3987_v1 }
  0xf4   :  { %v3999_v10 = vpop.f32.mrf.mxu0  ;;  %v566_v32 = vrot.slane %v4032_v48, 1  ;;  %v565_v35 = vsel %vm543_vm2, %v560_v39, %v564_v21 }
  0xf5   :  { %v4063_v19 = vpop.f32.mrf.mxu1 }
  0xf6   :  { %v4001_v11 = vpop.f32.mrf.mxu0  ;;  %v568_v1 = vrot.slane %v4063_v19, 1 }
  0xf8   :  { %v4005_v13 = vpop.f32.mrf.mxu0 }
  0xfa   :  { %v488_v14 = vpop.f32.mrf.mxu0 }
  0xfb   :  { %v623_v29 = vrot.slane %v488_v14, 2  ;;  %v594_v14 = vadd.f32 %v555_v46, %v3979_v59  ;;  %v3589_v59 = vld [vmem:[%s5010_s3 + $0x14] ss:$8 sps:$4 sm:$0xff]   ;;  %v3598_v46 = vld [vmem:[%s5010_s3 + $0x64] ss:$8 sps:$4 sm:$0xff]  }
  0xfc   :  { %v490_v22 = vpop.f32.mrf.mxu0  ;;  %965 = vmatprep.subr.bf16.mxu1 %v3589_v59 }
  0xfd   :  { %v626_v40 = vrot.slane %v490_v22, 2 }
  0xfe   :  { %v492_v25 = vpop.f32.mrf.mxu0 }
  0xff   :  { %v624_v30 = vrot.slane %v492_v25, 2 }
 0x100   :  { %v494_v36 = vpop.f32.mrf.mxu0 }
 0x101   :  { %v627_v41 = vrot.slane %v494_v36, 2  ;;  %v625_v42 = vsel %vm622_vm3, %v623_v29, %v624_v30  ;;  %v3587_v29 = vld [vmem:[%s5010_s3 + $0x10] ss:$8 sps:$4 sm:$0xff]  }
 0x102   :  { %v498_v44 = vpop.f32.mrf.mxu0  ;;  %v669_v60 = vadd.f32 %v625_v42, %v590_v45  ;;  %966 = vmatpush1.bf16.msra.mxu1 %v3587_v29  ;;  %v3595_v45 = vld [vmem:[%s5010_s3 + $0x4] ss:$8 sps:$4 sm:$0xff]  }
 0x103   :  { %v628_v49 = vsel %vm622_vm3, %v626_v40, %v627_v41  ;;  %v629_v50 = vrot.slane %v498_v44, 2  ;;  %967 = vmatprep.subr.bf16.mxu1 %v3595_v45  ;;  %v3599_v45 = vld [vmem:[%s5010_s3 + $0x114] ss:$8 sps:$4 sm:$0x1f]  }
 0x104   :  { %v500_v58 = vpop.f32.mrf.mxu0  ;;  %v4059_v18 = vadd.f32 %v628_v49, %v591_v43  ;;  %v701_v26 = vrot.slane %v669_v60, 1 }
 0x105   :  { %v630_v57 = vsel %vm622_vm3, %v624_v30, %v629_v50  ;;  %v631_v9 = vrot.slane %v500_v58, 2  ;;  %v3590_v30 = vld [vmem:[%s5010_s3 + $0x70] ss:$8 sps:$4 sm:$0xff]   ;;  %v599_v58 = vadd.f32 %v565_v35, %v3989_v4 }
 0x106   :  { %v4057_v16 = vadd.f32 %v630_v57, %v592_v53  ;;  %v502_v17 = vpop.f32.mrf.mxu0  ;;  %v704_v40 = vrot.slane %v4059_v18, 1  ;;  %1114 = vmatpush1.bf16.msra.mxu0 %v3590_v30  ;;  %v567_v53 = vsel %vm543_vm2, %v562_v55, %v566_v32  ;;  %968 = vmatpush1.bf16.msra.mxu1 %v3593_v52  ;;  %v3601_v52 = vld [vmem:[%s5010_s3 + $0x174] ss:$8 sps:$4 sm:$0x1f]  }
 0x107   :  { %v632_v22 = vsel %vm622_vm3, %v627_v41, %v631_v9  ;;  %v633_v23 = vrot.slane %v502_v17, 2  ;;  %v376_v41 = vpop.f32.mrf.mxu1  ;;  %1115 = vmatprep.subr.bf16.mxu0 %v3598_v46  ;;  %v600_v4 = vadd.f32 %v567_v53, %v3991_v5  ;;  %3105 = vmatprep.subr.msk.bf16.mxu1 %vm946_vm1, %v3599_v45 }
 0x108   :  { %v4073_v25 = vadd.f32 %v632_v22, %v593_v54  ;;  %v504_v62 = vpop.f32.mrf.mxu0  ;;  %v702_v27 = vrot.slane %v4057_v16, 1  ;;  %v570_v59 = vrot.slane %v376_v41, 1 }
 0x109   :  { %v634_v0 = vsel %vm622_vm3, %v629_v50, %v633_v23  ;;  %v635_v33 = vrot.slane %v504_v62, 2  ;;  %v378_v55 = vpop.f32.mrf.mxu1 }
 0x10a   :  { %v705_v34 = vrot.slane %v4073_v25, 1  ;;  %v673_v36 = vadd.f32 %v634_v0, %v594_v14  ;;  %v508_v37 = vpop.f32.mrf.mxu0  ;;  %v703_v38 = vsel %vm543_vm2, %v701_v26, %v702_v27  ;;  %1116 = vmatpush1.bf16.msra.mxu0 %v3596_v51  ;;  %v572_v5 = vrot.slane %v378_v55, 1 }
 0x10b   :  { %v636_v42 = vsel %vm622_vm3, %v631_v9, %v635_v33  ;;  %v637_v43 = vrot.slane %v508_v37, 2  ;;  %v4094_v44 = vmax.f32 %v669_v60, %v703_v38  ;;  %v571_v37 = vsel %vm543_vm2, %v566_v32, %v570_v59  ;;  %3134 = vmatprep.subr.msk.bf16.mxu0 %vm946_vm1, %v3601_v52 }
 0x10c   :  { %v4103_v12 = vadd.f32 %v636_v42, %v595_v15  ;;  %v510_v39 = vpop.f32.mrf.mxu0  ;;  %v706_v49 = vsel %vm543_vm2, %v704_v40, %v705_v34  ;;  %v707_v50 = vrot.slane %v673_v36, 1  ;;  %v604_v38 = vadd.f32 %v570_v59, %v4001_v11 }
 0x10d   :  { %v638_v54 = vsel %vm622_vm3, %v633_v23, %v637_v43  ;;  %v639_v56 = vrot.slane %v510_v39, 2  ;;  %779 = vrot.lane.b32.xlu0 %v4094_v44, %s3721_s23  ;;  %v748_v14 = vmax.f32 %v4059_v18, %v706_v49  ;;  %v569_v23 = vsel %vm543_vm2, %v564_v21, %v568_v1 }
 0x10e   :  { %v709_v60 = vrot.slane %v4103_v12, 1  ;;  %v675_v63 = vadd.f32 %v638_v54, %v596_v20  ;;  %v512_v3 = vpop.f32.mrf.mxu0  ;;  %v708_v6 = vsel %vm543_vm2, %v702_v27, %v707_v50  ;;  %v601_v30 = vadd.f32 %v569_v23, %v3993_v7 }
 0x10f   :  { %v640_v57 = vsel %vm622_vm3, %v635_v33, %v639_v56  ;;  %v641_v9 = vrot.slane %v512_v3, 2  ;;  %v4125_v15 = vmax.f32 %v4057_v16, %v708_v6  ;;  %v573_v7 = vsel %vm543_vm2, %v568_v1, %v572_v5 }
 0x110   :  { %v711_v17 = vrot.slane %v675_v63, 1  ;;  %v4128_v19 = vadd.f32 %v640_v57, %v597_v24  ;;  %v514_v20 = vpop.f32.mrf.mxu0  ;;  %v710_v22 = vsel %vm543_vm2, %v705_v34, %v709_v60  ;;  %v602_v46 = vadd.f32 %v571_v37, %v3995_v8 }
 0x111   :  { %v642_v61 = vsel %vm622_vm3, %v637_v43, %v641_v9  ;;  %v643_v18 = vrot.slane %v514_v20, 2  ;;  %781 = vrot.lane.b32.xlu0 %v748_v14, %s3721_s23  ;;  %783 = vrot.lane.b32.xlu1 %v4125_v15, %s3721_s23  ;;  %v750_v21 = vmax.f32 %v4073_v25, %v710_v22  ;;  %v605_v51 = vadd.f32 %v572_v5, %v4005_v13 }
 0x112   :  { %v713_v16 = vrot.slane %v4128_v19, 1  ;;  %v677_v24 = vadd.f32 %v642_v61, %v598_v47  ;;  %v518_v62 = vpop.f32.mrf.mxu0  ;;  %v712_v26 = vsel %vm543_vm2, %v707_v50, %v711_v17  ;;  %v603_v8 = vadd.f32 %v573_v7, %v3999_v10  ;;  %v3604_v7 = vld [vmem:[%s5010_s3 + $0x170] ss:$8 sps:$4 sm:$0x1f]  }
 0x113   :  { %v644_v28 = vsel %vm622_vm3, %v639_v56, %v643_v18  ;;  %v645_v27 = vrot.slane %v518_v62, 2  ;;  %v4142_v29 = vmax.f32 %v673_v36, %v712_v26  ;;  %v1394_v45 = vsel %vm946_vm1, %v3604_v7, 0 }
 0x114   :  { %v715_v31 = vrot.slane %v677_v24, 1  ;;  %v678_v0 = vadd.f32 %v644_v28, %v599_v58  ;;  %v520_v33 = vpop.f32.mrf.mxu0  ;;  %v714_v34 = vsel %vm543_vm2, %v709_v60, %v713_v16 }
 0x115   :  { %v646_v40 = vsel %vm622_vm3, %v641_v9, %v645_v27  ;;  %v647_v35 = vrot.slane %v520_v33, 2  ;;  %785 = vrot.lane.b32.xlu1 %v750_v21, %s3721_s23  ;;  %787 = vrot.lane.b32.xlu0 %v4142_v29, %s3721_s23  ;;  %v752_v11 = vmax.f32 %v4103_v12, %v714_v34  ;;  %v4210_v21 = vld [vmem:[%s5009_s2] ss:$0 sm:$0xff] }
 0x116   :  { %v717_v25 = vrot.slane %v678_v0, 1  ;;  %v679_v36 = vadd.f32 %v646_v40, %v600_v4  ;;  %v522_v41 = vpop.f32.mrf.mxu0  ;;  %v716_v42 = vsel %vm543_vm2, %v711_v17, %v715_v31 }
 0x117   :  { %v648_v48 = vsel %vm622_vm3, %v643_v18, %v647_v35  ;;  %v649_v32 = vrot.slane %v522_v41, 2  ;;  %v4158_v43 = vmax.f32 %v675_v63, %v716_v42 }
 0x118   :  { %v719_v47 = vrot.slane %v679_v36, 1  ;;  %v680_v39 = vadd.f32 %v648_v48, %v601_v30  ;;  %v524_v49 = vpop.f32.mrf.mxu0  ;;  %v718_v50 = vsel %vm543_vm2, %v713_v16, %v717_v25 }
 0x119   :  { %v650_v12 = vsel %vm622_vm3, %v645_v27, %v649_v32  ;;  %v683_v53 = vadd.f32 %v649_v32, %v604_v38  ;;  %v651_v1 = vrot.slane %v524_v49, 2  ;;  %789 = vrot.lane.b32.xlu1 %v752_v11, %s3721_s23  ;;  %791 = vrot.lane.b32.xlu0 %v4158_v43, %s3721_s23  ;;  %v754_v63 = vmax.f32 %v4128_v19, %v718_v50 }
 0x11a   :  { %v721_v54 = vrot.slane %v680_v39, 1  ;;  %v681_v56 = vadd.f32 %v650_v12, %v602_v46  ;;  %v720_v58 = vsel %vm543_vm2, %v715_v31, %v719_v47  ;;  %v3607_v46 = vld [vmem:[%s5010_s3 + $0x104] ss:$8 sps:$4 sm:$0xff]  }
 0x11b   :  { %v727_v13 = vrot.slane %v683_v53, 1  ;;  %v652_v60 = vsel %vm622_vm3, %v647_v35, %v651_v1  ;;  %v4179_v3 = vmax.f32 %v677_v24, %v720_v58  ;;  %v684_v57 = vadd.f32 %v651_v1, %v605_v51  ;;  %v3608_v51 = vld [vmem:[%s5010_s3 + $0x160] ss:$8 sps:$4 sm:$0xff]   ;;  %v3616_v1 = vld [vmem:[%s5010_s3 + $0x154] ss:$8 sps:$4 sm:$0xff]  }
 0x11c   :  { %v723_v6 = vrot.slane %v681_v56, 1  ;;  %v682_v55 = vadd.f32 %v652_v60, %v603_v8  ;;  %v722_v10 = vsel %vm543_vm2, %v717_v25, %v721_v54  ;;  %v3611_v60 = vld [vmem:[%s5010_s3 + $0xf0] ss:$8 sps:$4 sm:$0xff]  }
 0x11d   :  { %793 = vrot.lane.b32.xlu1 %v754_v63, %s3721_s23  ;;  %795 = vrot.lane.b32.xlu0 %v4179_v3, %s3721_s23  ;;  %v756_v4 = vmax.f32 %v678_v0, %v722_v10  ;;  %v729_v20 = vrot.slane %v684_v57, 1  ;;  %v4199_v18 = vmax.f32 %v683_v53, %v727_v13  ;;  %v3613_v53 = vld [vmem:[%s5010_s3 + $0xf4] ss:$8 sps:$4 sm:$0xff]   ;;  %v3614_v63 = vld [vmem:[%s5010_s3 + $0x150] ss:$8 sps:$4 sm:$0xff]  }
 0x11e   :  { %v725_v9 = vrot.slane %v682_v55, 1  ;;  %v724_v14 = vsel %vm543_vm2, %v719_v47, %v723_v6  ;;  %v728_v19 = vsel %vm543_vm2, %v723_v6, %v727_v13  ;;  %v3610_v47 = vld [vmem:[%s5010_s3 + $0x164] ss:$8 sps:$4 sm:$0xff]  }
 0x11f   :  { %v4186_v17 = vmax.f32 %v679_v36, %v724_v14  ;;  %v4193_v23 = vmax.f32 %v681_v56, %v728_v19  ;;  %v762_v16 = vmax.f32 %v684_v57, %v729_v20 }
 0x120   :  { %v726_v22 = vsel %vm543_vm2, %v721_v54, %v725_v9  ;;  %v730_v61 = vsel %vm543_vm2, %v725_v9, %v729_v20  ;;  %v3617_v20 = vld [vmem:[%s5010_s3 + $0xe0] ss:$8 sps:$4 sm:$0xff]  }
 0x121   :  { %797 = vrot.lane.b32.xlu1 %v756_v4, %s3721_s23  ;;  %799 = vrot.lane.b32.xlu0 %v4186_v17, %s3721_s23  ;;  %v758_v59 = vmax.f32 %v680_v39, %v726_v22  ;;  %v760_v5 = vmax.f32 %v682_v55, %v730_v61  ;;  %v3622_v55 = vld [vmem:[%s5010_s3 + $0x144] ss:$8 sps:$4 sm:$0xff]   ;;  %v3625_v22 = vld [vmem:[%s5010_s3 + $0xd4] ss:$8 sps:$4 sm:$0xff]  }
 0x125   :  { %803 = vrot.lane.b32.xlu0 %v4193_v23, %s3721_s23  ;;  %801 = vrot.lane.b32.xlu1 %v758_v59, %s3721_s23  ;;  %v3628_v59 = vld [vmem:[%s5010_s3 + $0x134] ss:$8 sps:$4 sm:$0xff]  }
 0x129   :  { %807 = vrot.lane.b32.xlu0 %v4199_v18, %s3721_s23  ;;  %805 = vrot.lane.b32.xlu1 %v760_v5, %s3721_s23 }
 0x12d   :  { %809 = vrot.lane.b32.xlu1 %v762_v16, %s3721_s23 }
 0x17f   :  { %v780_v24 = vpop.permute.xlu0 %779 }
 0x183   :  { %v782_v62 = vpop.permute.xlu0 %781  ;;  %v784_v26 = vpop.permute.xlu1 %783 }
 0x184   :  { %v812_v28 = vsel %vm811_vm4, %v780_v24, %v782_v62 }
 0x185   :  { %v828_v27 = vmax.f32 %v4094_v44, %v812_v28  ;;  %v3603_v44 = vld [vmem:[%s5010_s3 + $0x110] ss:$8 sps:$4 sm:$0x1f]  }
 0x186   :  { %v1244_v11 = vsel %vm946_vm1, %v3603_v44, 0  ;;  %v3623_v28 = vld [vmem:[%s5010_s3 + $0xd0] ss:$8 sps:$4 sm:$0xff]  }
 0x187   :  { %v786_v30 = vpop.permute.xlu1 %785  ;;  %v788_v31 = vpop.permute.xlu0 %787  ;;  %v843_v33 = vadd.f32 %v4210_v21, %v828_v27  ;;  %v3626_v27 = vld [vmem:[%s5010_s3 + $0x130] ss:$8 sps:$4 sm:$0xff]  }
 0x188   :  { %v813_v0 = vsel %vm811_vm4, %v784_v26, %v786_v30 }
 0x189   :  { %v829_v34 = vmax.f32 %v4125_v15, %v813_v0  ;;  %v851_v25 = vmax.f32 %v843_v33, 0.0 }
 0x18b   :  { %v844_v37 = vadd.f32 %v4210_v21, %v829_v34  ;;  %v790_v38 = vpop.permute.xlu1 %789  ;;  %v792_v40 = vpop.permute.xlu0 %791 }
 0x18c   :  { %v814_v35 = vsel %vm811_vm4, %v788_v31, %v790_v38  ;;  %v3634_v31 = vld [vmem:[%s5010_s3 + $0x124] ss:$8 sps:$4 sm:$0xff]   ;;  %v3635_v38 = vld [vmem:[%s5010_s3 + $0x1d4] ss:$8 sps:$4 sm:$0x1f]  }
 0x18d   :  { %v852_v36 = vmax.f32 %v844_v37, 0.0  ;;  %v830_v41 = vmax.f32 %v4142_v29, %v814_v35  ;;  %v3629_v37 = vld [vmem:[%s5010_s3 + $0xc0] ss:$8 sps:$4 sm:$0xff]  }
 0x18f   :  { %v4224_v15 = vpack.c.bf16 %v852_v36, %v851_v25  ;;  %v794_v42 = vpop.permute.xlu1 %793  ;;  %v796_v48 = vpop.permute.xlu0 %795  ;;  %v845_v29 = vadd.f32 %v4210_v21, %v830_v41  ;;  %v3640_v25 = vld [vmem:[%s5010_s3 + $0x1c4] ss:$8 sps:$4 sm:$0xff]   ;;  %v3638_v36 = vld [vmem:[%s5010_s3 + $0x1c0] ss:$8 sps:$4 sm:$0xff]   ;;  %v3643_v41 = vld [vmem:[%s5010_s3 + $0x1b4] ss:$8 sps:$4 sm:$0xff]  }
 0x190   :  { %v815_v32 = vsel %vm811_vm4, %v792_v40, %v794_v42  ;;  %v3641_v42 = vld [vmem:[%s5010_s3 + $0x1b0] ss:$8 sps:$4 sm:$0xff]  }
 0x191   :  { %v831_v39 = vmax.f32 %v4158_v43, %v815_v32  ;;  %3048 = vmatmul.mubr.msk.bf16.vlgmr.msra.gmra.mxu1 %vm933_vm5, %v4224_v15  ;;  %3077 = vmatmul.mubr.msk.bf16.vlgmr.msra.gmra.mxu0 %vm933_vm5, %v4224_v15  ;;  %v3605_v43 = vld [vmem:[%s5010_s3 + $0x100] ss:$8 sps:$4 sm:$0xff]   ;;  %v853_v8 = vmax.f32 %v845_v29, 0.0 }
 0x192   :  { %995 = vmatprep.mubr.bf16.mxu1 %v3720_v2  ;;  %1143 = vmatprep.mubr.bf16.mxu0 %v3720_v2  ;;  %v3644_v32 = vld [vmem:[%s5010_s3 + $0x1a0] ss:$8 sps:$4 sm:$0xff]  }
 0x193   :  { %v846_v49 = vadd.f32 %v4210_v21, %v831_v39  ;;  %v798_v50 = vpop.permute.xlu1 %797  ;;  %v800_v52 = vpop.permute.xlu0 %799  ;;  %1254 = vmatpush1.bf16.msra.mxu1 %v1244_v11  ;;  %1404 = vmatpush1.bf16.msra.mxu0 %v1394_v45  ;;  %v3649_v11 = vld [vmem:[%s5010_s3 + $0x194] ss:$8 sps:$4 sm:$0xff]   ;;  %v3647_v45 = vld [vmem:[%s5010_s3 + $0x190] ss:$8 sps:$4 sm:$0xff]   ;;  %v3653_v29 = vld [vmem:[%s5012_s5 + $0x20] sm:$0xff]   ;;  %v3722_v39 = vmov 0.0  }
 0x194   :  { %v816_v12 = vsel %vm811_vm4, %v796_v48, %v798_v50  ;;  %1255 = vmatprep.subr.bf16.mxu1 %v3607_v46  ;;  %1405 = vmatprep.subr.bf16.mxu0 %v3610_v47  ;;  %v3646_v48 = vld [vmem:[%s5010_s3 + $0x1a4] ss:$8 sps:$4 sm:$0xff]   ;;  %v3650_v47 = vld [vmem:[%s5010_s3 + $0x180] ss:$8 sps:$4 sm:$0xff]  }
 0x195   :  { %v854_v54 = vmax.f32 %v846_v49, 0.0  ;;  %v832_v56 = vmax.f32 %v4179_v3, %v816_v12  ;;  %v3619_v3 = vld [vmem:[%s5010_s3 + $0xe4] ss:$8 sps:$4 sm:$0xff]  }
 0x196   :  { %v3652_v46 = vld [vmem:[%s5010_s3 + $0x184] ss:$8 sps:$4 sm:$0xff]  }
 0x197   :  { %v4258_v58 = vpack.c.bf16 %v854_v54, %v853_v8  ;;  %v802_v13 = vpop.permute.xlu1 %801  ;;  %1256 = vmatpush1.bf16.msra.mxu1 %v3605_v43  ;;  %1406 = vmatpush1.bf16.msra.mxu0 %v3608_v51  ;;  %v847_v57 = vadd.f32 %v4210_v21, %v832_v56  ;;  %v804_v10 = vpop.permute.xlu0 %803 }
 0x198   :  { %v817_v6 = vsel %vm811_vm4, %v800_v52, %v802_v13  ;;  %1257 = vmatprep.subr.bf16.mxu1 %v3613_v53  ;;  %1407 = vmatprep.subr.bf16.mxu0 %v3616_v1 }
 0x199   :  { %v833_v9 = vmax.f32 %v4186_v17, %v817_v6  ;;  %3049 = vmatmul.mubr.msk.bf16.gmra.mxu1 %vm933_vm5, %v4258_v58  ;;  %3078 = vmatmul.mubr.msk.bf16.gmra.mxu0 %vm933_vm5, %v4258_v58  ;;  %v3620_v17 = vld [vmem:[%s5010_s3 + $0x140] ss:$8 sps:$4 sm:$0xff]   ;;  %v855_v61 = vmax.f32 %v847_v57, 0.0 }
 0x19a   :  { %1005 = vmatprep.mubr.bf16.mxu1 %v3720_v2  ;;  %1153 = vmatprep.mubr.bf16.mxu0 %v3720_v2 }
 0x19b   :  { %v848_v14 = vadd.f32 %v4210_v21, %v833_v9  ;;  %v806_v4 = vpop.permute.xlu1 %805  ;;  %1258 = vmatpush1.bf16.msra.mxu1 %v3611_v60  ;;  %1408 = vmatpush1.bf16.msra.mxu0 %v3614_v63  ;;  %v808_v62 = vpop.permute.xlu0 %807 }
 0x19c   :  { %v818_v19 = vsel %vm811_vm4, %v804_v10, %v806_v4  ;;  %1259 = vmatprep.subr.bf16.mxu1 %v3619_v3  ;;  %1409 = vmatprep.subr.bf16.mxu0 %v3622_v55 }
 0x19d   :  { %v856_v5 = vmax.f32 %v848_v14, 0.0  ;;  %v834_v16 = vmax.f32 %v4193_v23, %v818_v19  ;;  %v3631_v23 = vld [vmem:[%s5010_s3 + $0xc4] ss:$8 sps:$4 sm:$0xff]  }
 0x19f   :  { %v4296_v24 = vpack.c.bf16 %v856_v5, %v855_v61  ;;  %v810_v26 = vpop.permute.xlu1 %809  ;;  %1260 = vmatpush1.bf16.msra.mxu1 %v3617_v20  ;;  %1410 = vmatpush1.bf16.msra.mxu0 %v3620_v17  ;;  %v849_v0 = vadd.f32 %v4210_v21, %v834_v16 }
 0x1a0   :  { %v819_v30 = vsel %vm811_vm4, %v808_v62, %v810_v26  ;;  %1261 = vmatprep.subr.bf16.mxu1 %v3625_v22  ;;  %1411 = vmatprep.subr.bf16.mxu0 %v3628_v59 }
 0x1a1   :  { %v835_v33 = vmax.f32 %v4199_v18, %v819_v30  ;;  %3050 = vmatmul.mubr.msk.bf16.gmra.mxu1 %vm933_vm5, %v4296_v24  ;;  %3079 = vmatmul.mubr.msk.bf16.gmra.mxu0 %vm933_vm5, %v4296_v24  ;;  %v3632_v18 = vld [vmem:[%s5010_s3 + $0x120] ss:$8 sps:$4 sm:$0xff]   ;;  %v857_v40 = vmax.f32 %v849_v0, 0.0 }
 0x1a2   :  { %1015 = vmatprep.mubr.bf16.mxu1 %v3720_v2  ;;  %1163 = vmatprep.mubr.bf16.mxu0 %v3720_v2 }
 0x1a3   :  { %v850_v34 = vadd.f32 %v4210_v21, %v835_v33  ;;  %1262 = vmatpush1.bf16.msra.mxu1 %v3623_v28  ;;  %1412 = vmatpush1.bf16.msra.mxu0 %v3626_v27  ;;  %v3637_v21 = vld [vmem:[%s5010_s3 + $0x1d0] ss:$8 sps:$4 sm:$0x1f]  }
 0x1a4   :  { %1263 = vmatprep.subr.bf16.mxu1 %v3631_v23  ;;  %1413 = vmatprep.subr.bf16.mxu0 %v3634_v31  ;;  %v1544_v7 = vsel %vm946_vm1, %v3637_v21, 0 }
 0x1a5   :  { %v858_v35 = vmax.f32 %v850_v34, 0.0 }
 0x1a7   :  { %v862_v44 = vpack.c.bf16 %v858_v35, %v857_v40  ;;  %1264 = vmatpush1.bf16.msra.mxu1 %v3629_v37  ;;  %1414 = vmatpush1.bf16.msra.mxu0 %v3632_v18 }
 0x1a8   :  { %3163 = vmatprep.subr.msk.bf16.mxu1 %vm946_vm1, %v3635_v38  ;;  %3336 = vmatprep.subr.bf16.mxu0 %v3722_v39 }
 0x1a9   :  { %3051 = vmatmul.mubr.msk.bf16.gmra.mxu1 %vm933_vm5, %v862_v44  ;;  %3080 = vmatmul.mubr.msk.bf16.gmra.mxu0 %vm933_vm5, %v862_v44 }
 0x1aa   :  { %1281 = vmatprep.mubr.bf16.mxu1 %v3720_v2  ;;  %1431 = vmatprep.mubr.bf16.mxu0 %v3720_v2 }
 0x1b1   :  { %3106 = vmatmul.mubr.msk.bf16.vlgmr.msra.gmra.mxu1 %vm933_vm5, %v4224_v15  ;;  %3135 = vmatmul.mubr.msk.bf16.vlgmr.msra.gmra.mxu0 %vm933_vm5, %v4224_v15 }
 0x1b2   :  { %1291 = vmatprep.mubr.bf16.mxu1 %v3720_v2  ;;  %1441 = vmatprep.mubr.bf16.mxu0 %v3720_v2 }
 0x1b3   :  { %1554 = vmatpush1.bf16.msra.mxu1 %v1544_v7 }
 0x1b4   :  { %1555 = vmatprep.subr.bf16.mxu1 %v3640_v25 }
 0x1b7   :  { %1556 = vmatpush1.bf16.msra.mxu1 %v3638_v36 }
 0x1b8   :  { %1557 = vmatprep.subr.bf16.mxu1 %v3643_v41 }
 0x1b9   :  { %3107 = vmatmul.mubr.msk.bf16.gmra.mxu1 %vm933_vm5, %v4258_v58  ;;  %3136 = vmatmul.mubr.msk.bf16.gmra.mxu0 %vm933_vm5, %v4258_v58 }
 0x1ba   :  { %1301 = vmatprep.mubr.bf16.mxu1 %v3720_v2  ;;  %1451 = vmatprep.mubr.bf16.mxu0 %v3720_v2 }
 0x1bb   :  { %1558 = vmatpush1.bf16.msra.mxu1 %v3641_v42 }
 0x1bc   :  { %1559 = vmatprep.subr.bf16.mxu1 %v3646_v48 }
 0x1bf   :  { %1560 = vmatpush1.bf16.msra.mxu1 %v3644_v32 }
 0x1c0   :  { %1561 = vmatprep.subr.bf16.mxu1 %v3649_v11 }
 0x1c1   :  { %3108 = vmatmul.mubr.msk.bf16.gmra.mxu1 %vm933_vm5, %v4296_v24  ;;  %3137 = vmatmul.mubr.msk.bf16.gmra.mxu0 %vm933_vm5, %v4296_v24 }
 0x1c2   :  { %1311 = vmatprep.mubr.bf16.mxu1 %v3720_v2  ;;  %1461 = vmatprep.mubr.bf16.mxu0 %v3720_v2 }
 0x1c3   :  { %1562 = vmatpush1.bf16.msra.mxu1 %v3647_v45 }
 0x1c4   :  { %1563 = vmatprep.subr.bf16.mxu1 %v3652_v46 }
 0x1c7   :  { %1564 = vmatpush1.bf16.msra.mxu1 %v3650_v47 }
 0x1c8   :  { %3358 = vmatprep.subr.bf16.mxu1 %v3722_v39 }
 0x1c9   :  { %3109 = vmatmul.mubr.msk.bf16.gmra.mxu1 %vm933_vm5, %v862_v44  ;;  %3138 = vmatmul.mubr.msk.bf16.gmra.mxu0 %vm933_vm5, %v862_v44 }
 0x1ca   :  { %1581 = vmatprep.mubr.bf16.mxu1 %v3720_v2  ;;  %3346 = vmatprep.mubr.msk.bf16.mxu0 %vm3724_vm8, %v3722_v39 }
 0x1d1   :  { %3164 = vmatmul.mubr.msk.bf16.vlgmr.msra.gmra.mxu1 %vm933_vm5, %v4224_v15 }
 0x1d2   :  { %1589 = vmatprep.mubr.bf16.mxu1 %v3720_v2  ;;  %3359 = vmatpush3.bf16.msra.mxu1 %v3653_v29 }
 0x1d3   :  { %3360 = vmatprep.subr.bf16.mxu1 %v3722_v39 }
 0x1d9   :  { %3165 = vmatmul.mubr.msk.bf16.gmra.mxu1 %vm933_vm5, %v4258_v58 }
 0x1da   :  { %1599 = vmatprep.mubr.bf16.mxu1 %v3720_v2 }
 0x1e1   :  { %3166 = vmatmul.mubr.msk.bf16.gmra.mxu1 %vm933_vm5, %v4296_v24 }
 0x1e2   :  { %1609 = vmatprep.mubr.bf16.mxu1 %v3720_v2 }
 0x1e9   :  { %3167 = vmatmul.mubr.msk.bf16.gmra.mxu1 %vm933_vm5, %v862_v44 }
 0x1ea   :  { %3368 = vmatprep.mubr.msk.bf16.mxu1 %vm3724_vm8, %v3722_v39 }
 0x251   :  { %v4405_v15 = vpop.f32.mrf.mxu1  ;;  %v1135_v49 = vpop.f32.mrf.mxu0 }
 0x252   :  { %v1634_v35 = vrot.slane %v1135_v49, 2 }
 0x253   :  { %v4407_v50 = vpop.f32.mrf.mxu1  ;;  %v1137_v2 = vpop.f32.mrf.mxu0 }
 0x254   :  { %v1637_v21 = vrot.slane %v1137_v2, 2 }
 0x255   :  { %v4409_v52 = vpop.f32.mrf.mxu1  ;;  %v1139_v43 = vpop.f32.mrf.mxu0 }
 0x256   :  { %v1635_v18 = vrot.slane %v1139_v43, 2 }
 0x257   :  { %v4411_v51 = vpop.f32.mrf.mxu1  ;;  %v1141_v12 = vpop.f32.mrf.mxu0 }
 0x258   :  { %v1638_v40 = vrot.slane %v1141_v12, 2  ;;  %v1636_v41 = vsel %vm622_vm3, %v1634_v35, %v1635_v18 }
 0x259   :  { %v4413_v53 = vpop.f32.mrf.mxu1  ;;  %v4415_v1 = vpop.f32.mrf.mxu0 }
 0x25a   :  { %v1640_v7 = vrot.slane %v4415_v1, 2  ;;  %v1639_v32 = vsel %vm622_vm3, %v1637_v21, %v1638_v40  ;;  %v1674_v1 = vadd.f32 %v1636_v41, %v4405_v15 }
 0x25b   :  { %v4417_v8 = vpop.f32.mrf.mxu1  ;;  %v4419_v54 = vpop.f32.mrf.mxu0 }
 0x25c   :  { %v1642_v25 = vrot.slane %v4419_v54, 2  ;;  %v1641_v49 = vsel %vm622_vm3, %v1635_v18, %v1640_v7  ;;  %v1675_v54 = vadd.f32 %v1639_v32, %v4407_v50 }
 0x25d   :  { %v4421_v56 = vpop.f32.mrf.mxu1  ;;  %v4423_v58 = vpop.f32.mrf.mxu0 }
 0x25e   :  { %v1644_v42 = vrot.slane %v4423_v58, 2  ;;  %v1643_v2 = vsel %vm622_vm3, %v1638_v40, %v1642_v25 }
 0x25f   :  { %v4425_v13 = vpop.f32.mrf.mxu1  ;;  %v4427_v60 = vpop.f32.mrf.mxu0  ;;  %v1677_v15 = vadd.f32 %v1643_v2, %v4411_v51 }
 0x260   :  { %v1646_v11 = vrot.slane %v4427_v60, 2  ;;  %v1645_v58 = vsel %vm622_vm3, %v1640_v7, %v1644_v42 }
 0x261   :  { %v4429_v63 = vpop.f32.mrf.mxu1  ;;  %v4431_v6 = vpop.f32.mrf.mxu0 }
 0x262   :  { %v1648_v45 = vrot.slane %v4431_v6, 2 }
 0x263   :  { %v4433_v3 = vpop.f32.mrf.mxu1  ;;  %v4435_v55 = vpop.f32.mrf.mxu0 }
 0x264   :  { %v1650_v46 = vrot.slane %v4435_v55, 2  ;;  %v1647_v55 = vsel %vm622_vm3, %v1642_v25, %v1646_v11 }
 0x265   :  { %v4437_v57 = vpop.f32.mrf.mxu1  ;;  %v4439_v10 = vpop.f32.mrf.mxu0 }
 0x266   :  { %v1652_v47 = vrot.slane %v4439_v10, 2  ;;  %v1649_v10 = vsel %vm622_vm3, %v1644_v42, %v1648_v45 }
 0x267   :  { %v4441_v9 = vpop.f32.mrf.mxu1  ;;  %v4443_v14 = vpop.f32.mrf.mxu0  ;;  %v4527_v51 = vadd.f32 %v1649_v10, %v4421_v56 }
 0x268   :  { %v1654_v43 = vrot.slane %v4443_v14, 2  ;;  %v1651_v14 = vsel %vm622_vm3, %v1646_v11, %v1650_v46  ;;  %v1653_v50 = vsel %vm622_vm3, %v1648_v45, %v1652_v47 }
 0x269   :  { %v4445_v4 = vpop.f32.mrf.mxu1  ;;  %v4447_v20 = vpop.f32.mrf.mxu0 }
 0x26a   :  { %v1656_v60 = vrot.slane %v4447_v20, 2  ;;  %v1655_v18 = vsel %vm622_vm3, %v1650_v46, %v1654_v43 }
 0x26b   :  { %v4449_v17 = vpop.f32.mrf.mxu1  ;;  %v4451_v19 = vpop.f32.mrf.mxu0 }
 0x26c   :  { %v4545_v56 = vadd.f32 %v1656_v60, %v4445_v4 }
 0x26d   :  { %v1021_v22 = vpop.f32.mrf.mxu1  ;;  %v1169_v59 = vpop.f32.mrf.mxu0 }
 0x26e   :  { %v1676_v59 = vadd.f32 %v1641_v49, %v4409_v52  ;;  %v1679_v52 = vadd.f32 %v1647_v55, %v4417_v8  ;;  %v4542_v8 = vadd.f32 %v1655_v18, %v4433_v3 }
 0x26f   :  { %v1022_v61 = vpop.f32.mrf.mxu1  ;;  %v1170_v5 = vpop.f32.mrf.mxu0 }
 0x270   :  { %v1658_v61 = vrot.slane %v4451_v19, 2  ;;  %v1678_v5 = vadd.f32 %v1645_v58, %v4413_v53  ;;  %v1657_v19 = vsel %vm622_vm3, %v1652_v47, %v1656_v60  ;;  %v4536_v53 = vadd.f32 %v1653_v50, %v4429_v63 }
 0x271   :  { %v4453_v16 = vpop.f32.mrf.mxu1  ;;  %v4455_v24 = vpop.f32.mrf.mxu0  ;;  %v4552_v63 = vadd.f32 %v1657_v19, %v4437_v57 }
 0x272   :  { %v1705_v40 = vrot.slane %v4453_v16, 4  ;;  %v4560_v4 = vadd.f32 %v1658_v61, %v4449_v17 }
 0x273   :  { %v4457_v62 = vpop.f32.mrf.mxu1  ;;  %v4459_v26 = vpop.f32.mrf.mxu0 }
 0x274   :  { %v1708_v16 = vrot.slane %v4457_v62, 4  ;;  %v1783_v49 = vrot.slane %v4459_v26, 6  ;;  %v3654_v26 = vld [vmem:[%s5012_s5 + $0x18] sm:$0xff]  }
 0x275   :  { %v4461_v28 = vpop.f32.mrf.mxu1  ;;  %v4463_v27 = vpop.f32.mrf.mxu0  ;;  %3361 = vmatpush3.bf16.msra.mxu1 %v3654_v26 }
 0x276   :  { %v1706_v22 = vrot.slane %v4461_v28, 4  ;;  %v4530_v28 = vadd.f32 %v1651_v14, %v4425_v13  ;;  %v1659_v13 = vsel %vm622_vm3, %v1654_v43, %v1658_v61  ;;  %v1781_v62 = vrot.slane %v4463_v27, 6  ;;  %3362 = vmatprep.subr.bf16.mxu1 %v3722_v39 }
 0x277   :  { %v4465_v30 = vpop.f32.mrf.mxu1  ;;  %v4467_v23 = vpop.f32.mrf.mxu0  ;;  %v4567_v57 = vadd.f32 %v1659_v13, %v4441_v9  ;;  %v1780_v27 = vrot.slane %v4455_v24, 6 }
 0x278   :  { %v1709_v35 = vrot.slane %v4465_v30, 4  ;;  %v1707_v30 = vsel %vm1704_vm6, %v1705_v40, %v1706_v22  ;;  %v1784_v11 = vrot.slane %v4467_v23, 6 }
 0x279   :  { %v4469_v31 = vpop.f32.mrf.mxu1  ;;  %v4471_v0 = vpop.f32.mrf.mxu0  ;;  %v1749_v46 = vadd.f32 %v1707_v30, %v1674_v1  ;;  %v1782_v24 = vsel %vm1779_vm7, %v1780_v27, %v1781_v62 }
 0x27a   :  { %v1711_v25 = vrot.slane %v4469_v31, 4  ;;  %v1710_v32 = vsel %vm1704_vm6, %v1708_v16, %v1709_v35  ;;  %v1786_v17 = vrot.slane %v4471_v0, 6 }
 0x27b   :  { %v4473_v33 = vpop.f32.mrf.mxu1  ;;  %v4477_v37 = vpop.f32.mrf.mxu0  ;;  %v1824_v60 = vadd.f32 %v1782_v24, %v1749_v46 }
 0x27c   :  { %v1713_v41 = vrot.slane %v4473_v33, 4  ;;  %v1712_v47 = vsel %vm1704_vm6, %v1706_v22, %v1711_v25  ;;  %v1788_v43 = vrot.slane %v4477_v37, 6  ;;  %v1787_v18 = vsel %vm1779_vm7, %v1781_v62, %v1786_v17 }
 0x27d   :  { %v4475_v34 = vpop.f32.mrf.mxu1  ;;  %v4485_v36 = vpop.f32.mrf.mxu0  ;;  %v1751_v55 = vadd.f32 %v1712_v47, %v1676_v59 }
 0x27e   :  { %v1715_v31 = vrot.slane %v4475_v34, 4  ;;  %v1714_v23 = vsel %vm1704_vm6, %v1709_v35, %v1713_v41  ;;  %v1790_v37 = vrot.slane %v4485_v36, 6 }
 0x27f   :  { %v4479_v38 = vpop.f32.mrf.mxu1  ;;  %v4501_v12 = vpop.f32.mrf.mxu0  ;;  %v1752_v14 = vadd.f32 %v1714_v23, %v1677_v15  ;;  %v3655_v15 = vld [vmem:[%s5012_s5 + $0x10] sm:$0xff]   ;;  %v1826_v30 = vadd.f32 %v1787_v18, %v1751_v55 }
 0x280   :  { %v1717_v33 = vrot.slane %v4479_v38, 4  ;;  %v1750_v38 = vadd.f32 %v1710_v32, %v1675_v54  ;;  %v1716_v1 = vsel %vm1704_vm6, %v1711_v25, %v1715_v31  ;;  %v1785_v54 = vsel %vm1779_vm7, %v1783_v49, %v1784_v11  ;;  %3363 = vmatpush3.bf16.msra.mxu1 %v3655_v15 }
 0x281   :  { %v4481_v44 = vpop.f32.mrf.mxu1  ;;  %v4523_v21 = vpop.f32.mrf.mxu0  ;;  %v1792_v10 = vrot.slane %v4501_v12, 6  ;;  %v1753_v40 = vadd.f32 %v1716_v1, %v1678_v5  ;;  %v1789_v12 = vsel %vm1779_vm7, %v1784_v11, %v1788_v43  ;;  %3364 = vmatprep.subr.bf16.mxu1 %v3722_v39 }
 0x282   :  { %v1719_v34 = vrot.slane %v4481_v44, 4  ;;  %v1718_v0 = vsel %vm1704_vm6, %v1713_v41, %v1717_v33  ;;  %v1794_v22 = vrot.slane %v4523_v21, 6  ;;  %v1825_v61 = vadd.f32 %v1785_v54, %v1750_v38 }
 0x283   :  { %v4489_v48 = vpop.f32.mrf.mxu1  ;;  %v4557_v3 = vpop.f32.mrf.mxu0  ;;  %v1754_v19 = vadd.f32 %v1718_v0, %v1679_v52  ;;  %v1827_v41 = vadd.f32 %v1789_v12, %v1752_v14  ;;  %v1793_v62 = vsel %vm1779_vm7, %v1788_v43, %v1792_v10 }
 0x284   :  { %v1721_v9 = vrot.slane %v4489_v48, 4  ;;  %v1720_v48 = vsel %vm1704_vm6, %v1715_v31, %v1719_v34  ;;  %v1796_v21 = vrot.slane %v4557_v3, 6  ;;  %v1795_v11 = vsel %vm1779_vm7, %v1790_v37, %v1794_v22 }
 0x285   :  { %v4496_v29 = vpop.f32.mrf.mxu1  ;;  %v4578_v58 = vpop.f32.mrf.mxu0  ;;  %v1755_v25 = vadd.f32 %v1720_v48, %v4527_v51  ;;  %v1829_v49 = vadd.f32 %v1793_v62, %v1754_v19 }
 0x286   :  { %v1722_v35 = vsel %vm1704_vm6, %v1717_v33, %v1721_v9  ;;  %v1723_v59 = vrot.slane %v4496_v29, 4  ;;  %v1791_v29 = vsel %vm1779_vm7, %v1786_v17, %v1790_v37  ;;  %v1798_v52 = vrot.slane %v4578_v58, 6  ;;  %v3656_v33 = vld [vmem:[%s5012_s5 + $0x48] sm:$0xff]  }
 0x287   :  { %v4507_v6 = vpop.f32.mrf.mxu1  ;;  %v4594_v36 = vpop.f32.mrf.mxu0  ;;  %v1828_v31 = vadd.f32 %v1791_v29, %v1753_v40  ;;  %v1756_v3 = vadd.f32 %v1722_v35, %v4530_v28  ;;  %v3657_v17 = vld [vmem:[%s5012_s5 + $0x8] sm:$0xff]   ;;  %v1830_v38 = vadd.f32 %v1795_v11, %v1755_v25  ;;  %v1797_v43 = vsel %vm1779_vm7, %v1792_v10, %v1796_v21  ;;  %3337 = vmatpush3.bf16.msra.mxu0 %v3656_v33 }
 0x288   :  { %v1725_v16 = vrot.slane %v4507_v6, 4  ;;  %v1724_v51 = vsel %vm1704_vm6, %v1719_v34, %v1723_v59  ;;  %v1800_v23 = vrot.slane %v4594_v36, 6  ;;  %3365 = vmatpush3.bf16.msra.mxu1 %v3657_v17  ;;  %3338 = vmatprep.subr.bf16.mxu0 %v3722_v39  ;;  %v1799_v54 = vsel %vm1779_vm7, %v1794_v22, %v1798_v52  ;;  %v3661_v17 = vld [vmem:[%s5012_s5 + $0x30] sm:$0xff]  }
 0x289   :  { %v4517_v20 = vpop.f32.mrf.mxu1  ;;  %v4613_v46 = vpop.f32.mrf.mxu0  ;;  %3366 = vmatprep.subr.bf16.mxu1 %v3722_v39 }
 0x28a   :  { %v1726_v28 = vsel %vm1704_vm6, %v1721_v9, %v1725_v16  ;;  %v1727_v34 = vrot.slane %v4517_v20, 4  ;;  %v1831_v9 = vadd.f32 %v1797_v43, %v1756_v3  ;;  %v3658_v20 = vld [vmem:[%s5012_s5 + $0x40] sm:$0xff]   ;;  %v1802_v22 = vrot.slane %v4613_v46, 6 }
 0x28b   :  { %v4533_v7 = vpop.f32.mrf.mxu1  ;;  %v4636_v55 = vpop.f32.mrf.mxu0  ;;  %v1758_v18 = vadd.f32 %v1726_v28, %v4542_v8  ;;  %v1801_v40 = vsel %vm1779_vm7, %v1796_v21, %v1800_v23  ;;  %3339 = vmatpush3.bf16.msra.mxu0 %v3658_v20 }
 0x28c   :  { %v1729_v0 = vrot.slane %v4533_v7, 4  ;;  %v1728_v35 = vsel %vm1704_vm6, %v1723_v59, %v1727_v34  ;;  %3340 = vmatprep.subr.bf16.mxu0 %v3722_v39  ;;  %v3660_v59 = vld [vmem:[%s5012_s5 + $0x38] sm:$0xff]  }
 0x28d   :  { %v4549_v42 = vpop.f32.mrf.mxu1 }
 0x28e   :  { %v1730_v25 = vsel %vm1704_vm6, %v1725_v16, %v1729_v0 }
 0x28f   :  { %v4564_v45 = vpop.f32.mrf.mxu1  ;;  %3341 = vmatpush3.bf16.msra.mxu0 %v3660_v59 }
 0x290   :  { %v1733_v62 = vrot.slane %v4564_v45, 4  ;;  %3342 = vmatprep.subr.bf16.mxu0 %v3722_v39 }
 0x291   :  { %v1583_v2 = vpop.f32.mrf.mxu1 }
 0x293   :  { %v1584_v44 = vpop.f32.mrf.mxu1  ;;  %3343 = vmatpush3.bf16.msra.mxu0 %v3661_v17 }
 0x294   :  { %3344 = vmatprep.subr.bf16.mxu0 %v3722_v39 }
 0x295   :  { %v1585_v50 = vpop.f32.mrf.mxu1 }
 0x296   :  { %v1838_v13 = vadd.f32 %v1824_v60, %v1585_v50  ;;  %v1757_v60 = vadd.f32 %v1724_v51, %v4536_v53  ;;  %v3659_v53 = vld [vmem:[%s5012_s5] sm:$0xff]   ;;  %v1803_v51 = vsel %vm1779_vm7, %v1798_v52, %v1802_v22 }
 0x297   :  { %v1587_v5 = vpop.f32.mrf.mxu1  ;;  %3367 = vmatpush3.bf16.msra.mxu1 %v3659_v53 }
 0x298   :  { %v1839_v27 = vadd.f32 %v1825_v61, %v1587_v5  ;;  %v1866_v1 = vrot.slane %v1838_v13, 2  ;;  %v1804_v5 = vrot.slane %v4636_v55, 6  ;;  %3402 = vmatprep.subr.bf16.mxu1 %v3722_v39  ;;  %v1832_v16 = vadd.f32 %v1799_v54, %v1757_v60  ;;  %v3663_v54 = vld [vmem:[%s5012_s5 + $0x28] sm:$0xff]  }
 0x299   :  { %v1591_v32 = vpop.f32.mrf.mxu1  ;;  %3345 = vmatpush3.bf16.msra.mxu0 %v3663_v54 }
 0x29a   :  { %v1840_v47 = vadd.f32 %v1826_v30, %v1591_v32  ;;  %v1869_v37 = vrot.slane %v1839_v27, 2  ;;  %v1731_v30 = vrot.slane %v4549_v42, 4  ;;  %3380 = vmatprep.subr.bf16.mxu0 %v3722_v39 }
 0x29b   :  { %v1593_v2 = vpop.f32.mrf.mxu1 }
 0x29c   :  { %v1867_v24 = vrot.slane %v1840_v47, 2  ;;  %v4624_v26 = vadd.f32 %v1827_v41, %v1593_v2  ;;  %v1732_v45 = vsel %vm1704_vm6, %v1727_v34, %v1731_v30 }
 0x29d   :  { %v1595_v44 = vpop.f32.mrf.mxu1  ;;  %v1761_v36 = vadd.f32 %v1732_v45, %v4545_v56  ;;  %v4755_v45 = vld [vmem:[%s5011_s4] ss:$0 sm:$0xff] }
 0x29e   :  { %v1870_v10 = vrot.slane %v4624_v26, 2  ;;  %v1842_v48 = vadd.f32 %v1828_v31, %v1595_v44  ;;  %v1868_v14 = vsel %vm622_vm3, %v1866_v1, %v1867_v24  ;;  %v1759_v31 = vadd.f32 %v1728_v35, %v4552_v63 }
 0x29f   :  { %v1597_v50 = vpop.f32.mrf.mxu1  ;;  %v4644_v61 = vmax.f32 %v1838_v13, %v1868_v14  ;;  %v1467_v13 = vpop.f32.mrf.mxu0 }
 0x2a0   :  { %v1872_v12 = vrot.slane %v1842_v48, 2  ;;  %v4651_v19 = vadd.f32 %v1829_v49, %v1597_v50  ;;  %v1871_v15 = vsel %vm622_vm3, %v1869_v37, %v1870_v10  ;;  %v1760_v49 = vadd.f32 %v1730_v25, %v4567_v57 }
 0x2a1   :  { %1934 = vrot.lane.b32.xlu0 %v4644_v61, %s3723_s16  ;;  %v1601_v8 = vpop.f32.mrf.mxu1  ;;  %v1907_v21 = vmax.f32 %v1839_v27, %v1871_v15  ;;  %v1469_v58 = vpop.f32.mrf.mxu0  ;;  %v1806_v43 = vrot.slane %v1467_v13, 6  ;;  %v1734_v57 = vsel %vm1704_vm6, %v1729_v0, %v1733_v62 }
 0x2a2   :  { %v1874_v42 = vrot.slane %v4651_v19, 2  ;;  %v1844_v41 = vadd.f32 %v1830_v38, %v1601_v8  ;;  %v1873_v29 = vsel %vm622_vm3, %v1867_v24, %v1872_v12  ;;  %v1805_v38 = vsel %vm1779_vm7, %v1800_v23, %v1804_v5 }
 0x2a3   :  { %1936 = vrot.lane.b32.xlu1 %v1907_v21, %s3723_s16  ;;  %v1603_v6 = vpop.f32.mrf.mxu1  ;;  %v4676_v32 = vmax.f32 %v1840_v47, %v1873_v29  ;;  %v1833_v47 = vadd.f32 %v1801_v40, %v1758_v18  ;;  %v1834_v24 = vadd.f32 %v1803_v51, %v1759_v31  ;;  %v1808_v23 = vrot.slane %v1469_v58, 6 }
 0x2a4   :  { %v1876_v11 = vrot.slane %v1844_v41, 2  ;;  %v1845_v3 = vadd.f32 %v1831_v9, %v1603_v6  ;;  %v1875_v33 = vsel %vm622_vm3, %v1870_v10, %v1874_v42  ;;  %v1835_v60 = vadd.f32 %v1805_v38, %v1760_v49 }
 0x2a5   :  { %1938 = vrot.lane.b32.xlu0 %v4676_v32, %s3723_s16  ;;  %v1605_v27 = vpop.f32.mrf.mxu1  ;;  %v1909_v63 = vmax.f32 %v4624_v26, %v1875_v33  ;;  %v1762_v56 = vadd.f32 %v1734_v57, %v4560_v4  ;;  %v1807_v53 = vsel %vm1779_vm7, %v1802_v22, %v1806_v43  ;;  %v3662_v57 = vld [vmem:[%s5012_s5 + $0x98] sm:$0xff]  }
 0x2a6   :  { %v1878_v28 = vrot.slane %v1845_v3, 2  ;;  %v1846_v52 = vadd.f32 %v1832_v16, %v1605_v27  ;;  %v1877_v2 = vsel %vm622_vm3, %v1872_v12, %v1876_v11  ;;  %v1836_v40 = vadd.f32 %v1807_v53, %v1761_v36 }
 0x2a7   :  { %1940 = vrot.lane.b32.xlu1 %v1909_v63, %s3723_s16  ;;  %v1607_v34 = vpop.f32.mrf.mxu1  ;;  %v4704_v1 = vmax.f32 %v1842_v48, %v1877_v2 }
 0x2a8   :  { %v1880_v26 = vrot.slane %v1846_v52, 2  ;;  %v1847_v44 = vadd.f32 %v1833_v47, %v1607_v34  ;;  %v1879_v9 = vsel %vm622_vm3, %v1874_v42, %v1878_v28 }
 0x2a9   :  { %1942 = vrot.lane.b32.xlu0 %v4704_v1, %s3723_s16  ;;  %v1611_v7 = vpop.f32.mrf.mxu1  ;;  %v1911_v0 = vmax.f32 %v4651_v19, %v1879_v9  ;;  %v1809_v19 = vsel %vm1779_vm7, %v1804_v5, %v1808_v23 }
 0x2aa   :  { %v1882_v20 = vrot.slane %v1847_v44, 2  ;;  %v1848_v37 = vadd.f32 %v1834_v24, %v1611_v7  ;;  %v1881_v10 = vsel %vm622_vm3, %v1876_v11, %v1880_v26  ;;  %v1837_v22 = vadd.f32 %v1809_v19, %v1762_v56 }
 0x2ab   :  { %1944 = vrot.lane.b32.xlu1 %v1911_v0, %s3723_s16  ;;  %v1613_v48 = vpop.f32.mrf.mxu1  ;;  %v4718_v14 = vmax.f32 %v1844_v41, %v1881_v10 }
 0x2ac   :  { %v1884_v50 = vrot.slane %v1848_v37, 2  ;;  %v1849_v18 = vadd.f32 %v1835_v60, %v1613_v48  ;;  %v1883_v35 = vsel %vm622_vm3, %v1878_v28, %v1882_v20 }
 0x2ad   :  { %1946 = vrot.lane.b32.xlu0 %v4718_v14, %s3723_s16  ;;  %v1615_v4 = vpop.f32.mrf.mxu1  ;;  %v1913_v12 = vmax.f32 %v1845_v3, %v1883_v35  ;;  %v3667_v35 = vld [vmem:[%s5012_s5 + $0x80] sm:$0xff]  }
 0x2ae   :  { %v1886_v46 = vrot.slane %v1849_v18, 2  ;;  %v1850_v15 = vadd.f32 %v1836_v40, %v1615_v4  ;;  %v1885_v30 = vsel %vm622_vm3, %v1880_v26, %v1884_v50  ;;  %v3666_v40 = vld [vmem:[%s5012_s5 + $0x70] sm:$0xff]  }
 0x2af   :  { %1948 = vrot.lane.b32.xlu1 %v1913_v12, %s3723_s16  ;;  %v1617_v8 = vpop.f32.mrf.mxu1  ;;  %v4732_v21 = vmax.f32 %v1846_v52, %v1885_v30 }
 0x2b0   :  { %v1888_v59 = vrot.slane %v1850_v15, 2  ;;  %v1851_v25 = vadd.f32 %v1837_v22, %v1617_v8  ;;  %v1887_v13 = vsel %vm622_vm3, %v1882_v20, %v1886_v46 }
 0x2b1   :  { %1950 = vrot.lane.b32.xlu0 %v4732_v21, %s3723_s16  ;;  %v1915_v55 = vmax.f32 %v1847_v44, %v1887_v13 }
 0x2b2   :  { %v1890_v42 = vrot.slane %v1851_v25, 2  ;;  %v1889_v5 = vsel %vm622_vm3, %v1884_v50, %v1888_v59  ;;  %v4744_v6 = vmax.f32 %v1850_v15, %v1888_v59  ;;  %v3669_v59 = vld [vmem:[%s5012_s5 + $0x78] sm:$0xff]  }
 0x2b3   :  { %1952 = vrot.lane.b32.xlu1 %v1915_v55, %s3723_s16  ;;  %v4739_v41 = vmax.f32 %v1848_v37, %v1889_v5  ;;  %v3665_v37 = vld [vmem:[%s5012_s5 + $0x88] sm:$0xff]  }
 0x2b4   :  { %v1891_v29 = vsel %vm622_vm3, %v1886_v46, %v1890_v42  ;;  %v1919_v16 = vmax.f32 %v1851_v25, %v1890_v42  ;;  %v3670_v42 = vld [vmem:[%s5012_s5 + $0x60] sm:$0xff]  }
 0x2b5   :  { %1954 = vrot.lane.b32.xlu0 %v4739_v41, %s3723_s16  ;;  %v1917_v62 = vmax.f32 %v1849_v18, %v1891_v29  ;;  %v3671_v29 = vld [vmem:[%s5012_s5 + $0x58] sm:$0xff]  }
 0x2b7   :  { %1956 = vrot.lane.b32.xlu1 %v1917_v62, %s3723_s16 }
 0x2b9   :  { %1958 = vrot.lane.b32.xlu0 %v4744_v6, %s3723_s16 }
 0x2bb   :  { %1960 = vrot.lane.b32.xlu1 %v1919_v16, %s3723_s16  ;;  %v3672_v16 = vld [vmem:[%s5012_s5 + $0x50] sm:$0xff]  }
 0x313   :  { %v1935_v31 = vpop.permute.xlu0 %1934 }
 0x315   :  { %v1937_v11 = vpop.permute.xlu1 %1936 }
 0x316   :  { %v1963_v3 = vsel %vm1962_vm9, %v1935_v31, %v1937_v11 }
 0x317   :  { %v1977_v33 = vmax.f32 %v4644_v61, %v1963_v3  ;;  %v1939_v51 = vpop.permute.xlu0 %1938 }
 0x319   :  { %v1941_v27 = vpop.permute.xlu1 %1940  ;;  %v1991_v47 = vadd.f32 %v4755_v45, %v1977_v33 }
 0x31a   :  { %v1964_v63 = vsel %vm1962_vm9, %v1939_v51, %v1941_v27  ;;  %v3673_v51 = vld [vmem:[%s5012_s5 + $0xc0] sm:$0xff]   ;;  %v3674_v27 = vld [vmem:[%s5012_s5 + $0xb8] sm:$0xff]  }
 0x31b   :  { %v1978_v49 = vmax.f32 %v4676_v32, %v1964_v63  ;;  %v1943_v17 = vpop.permute.xlu0 %1942  ;;  %v1998_v61 = vmax.f32 %v1991_v47, 0.0  ;;  %v3675_v47 = vld [vmem:[%s5012_s5 + $0xb0] sm:$0xff]  }
 0x31d   :  { %v1992_v58 = vadd.f32 %v4755_v45, %v1978_v49  ;;  %v1945_v28 = vpop.permute.xlu1 %1944 }
 0x31e   :  { %v1965_v52 = vsel %vm1962_vm9, %v1943_v17, %v1945_v28  ;;  %v3676_v17 = vld [vmem:[%s5012_s5 + $0xa8] sm:$0xff]  }
 0x31f   :  { %v1999_v2 = vmax.f32 %v1992_v58, 0.0  ;;  %v1979_v38 = vmax.f32 %v4704_v1, %v1965_v52  ;;  %v1947_v43 = vpop.permute.xlu0 %1946  ;;  %v3664_v1 = vld [vmem:[%s5012_s5 + $0x90] sm:$0xff]   ;;  %v3677_v58 = vld [vmem:[%s5012_s5 + $0xa0] sm:$0xff]  }
 0x321   :  { %v4766_v34 = vpack.c.bf16 %v1999_v2, %v1998_v61  ;;  %v1949_v24 = vpop.permute.xlu1 %1948  ;;  %v1993_v26 = vadd.f32 %v4755_v45, %v1979_v38 }
 0x322   :  { %v1966_v32 = vsel %vm1962_vm9, %v1947_v43, %v1949_v24 }
 0x323   :  { %v1980_v44 = vmax.f32 %v4718_v14, %v1966_v32  ;;  %3369 = vmatmul.mubr.msk.bf16.vlgmr.msra.gmra.mxu1 %vm2069_vm10, %v4766_v34  ;;  %v1951_v9 = vpop.permute.xlu0 %1950  ;;  %v2000_v0 = vmax.f32 %v1993_v26, 0.0  ;;  %v2034_v50 = vrot.slane %v4766_v34, 2  ;;  %v2359_v62 = vrot.slane %v4766_v34, 6 }
 0x324   :  { %3403 = vmatpush3.bf16.msra.mxu1 %v3662_v57  ;;  %3372 = vmatprep.mubr.msk.bf16.mxu1 %vm3724_vm8, %v3722_v39  ;;  %v2242_v33 = vrot.slane %v4766_v34, 4 }
 0x325   :  { %v1994_v36 = vadd.f32 %v4755_v45, %v1980_v44  ;;  %v1953_v23 = vpop.permute.xlu1 %1952  ;;  %3404 = vmatprep.subr.bf16.mxu1 %v3722_v39 }
 0x326   :  { %v1967_v7 = vsel %vm1962_vm9, %v1951_v9, %v1953_v23 }
 0x327   :  { %v2001_v60 = vmax.f32 %v1994_v36, 0.0  ;;  %v1981_v54 = vmax.f32 %v4732_v21, %v1967_v7  ;;  %v1955_v20 = vpop.permute.xlu0 %1954  ;;  %v3668_v21 = vld [vmem:[%s5012_s5 + $0x68] sm:$0xff]  }
 0x328   :  { %3405 = vmatpush3.bf16.msra.mxu1 %v3664_v1 }
 0x329   :  { %v4785_v10 = vpack.c.bf16 %v2001_v60, %v2000_v0  ;;  %v1957_v56 = vpop.permute.xlu1 %1956  ;;  %3406 = vmatprep.subr.bf16.mxu1 %v3722_v39  ;;  %v1995_v14 = vadd.f32 %v4755_v45, %v1981_v54 }
 0x32a   :  { %v1968_v48 = vsel %vm1962_vm9, %v1955_v20, %v1957_v56 }
 0x32b   :  { %v1982_v53 = vmax.f32 %v4739_v41, %v1968_v48  ;;  %3373 = vmatmul.mubr.msk.bf16.gmra.mxu1 %vm2069_vm10, %v4785_v10  ;;  %v2035_v18 = vrot.slane %v4785_v10, 2  ;;  %v1959_v12 = vpop.permute.xlu0 %1958  ;;  %v2002_v22 = vmax.f32 %v1995_v14, 0.0  ;;  %v2360_v41 = vrot.slane %v4785_v10, 6 }
 0x32c   :  { %3407 = vmatpush3.bf16.msra.mxu1 %v3665_v37  ;;  %3376 = vmatprep.mubr.msk.bf16.mxu1 %vm3724_vm8, %v3722_v39  ;;  %v2243_v11 = vrot.slane %v4785_v10, 4 }
 0x32d   :  { %v1996_v4 = vadd.f32 %v4755_v45, %v1982_v53  ;;  %v1961_v19 = vpop.permute.xlu1 %1960  ;;  %v2036_v46 = vsel %vm622_vm3, %v2034_v50, %v2035_v18  ;;  %3408 = vmatprep.subr.bf16.mxu1 %v3722_v39 }
 0x32e   :  { %v1969_v15 = vsel %vm1962_vm9, %v1959_v12, %v1961_v19  ;;  %3347 = vmatmul.mubr.msk.bf16.vlgmr.msra.gmra.mxu0 %vm2069_vm10, %v2036_v46 }
 0x32f   :  { %v2003_v30 = vmax.f32 %v1996_v4, 0.0  ;;  %v1983_v8 = vmax.f32 %v4744_v6, %v1969_v15  ;;  %3381 = vmatpush3.bf16.msra.mxu0 %v3666_v40  ;;  %3350 = vmatprep.mubr.msk.bf16.mxu0 %vm3724_vm8, %v3722_v39  ;;  %v2361_v6 = vsel %vm1779_vm7, %v2359_v62, %v2360_v41 }
 0x330   :  { %3409 = vmatpush3.bf16.msra.mxu1 %v3667_v35  ;;  %3382 = vmatprep.subr.bf16.mxu0 %v3722_v39 }
 0x331   :  { %v4818_v25 = vpack.c.bf16 %v2003_v30, %v2002_v22  ;;  %v4821_v13 = vadd.f32 %v4755_v45, %v1983_v8  ;;  %3410 = vmatprep.subr.bf16.mxu1 %v3722_v39  ;;  %v2244_v45 = vsel %vm1704_vm6, %v2242_v33, %v2243_v11 }
 0x333   :  { %3377 = vmatmul.mubr.msk.bf16.gmra.mxu1 %vm2069_vm10, %v4818_v25  ;;  %v2037_v55 = vrot.slane %v4818_v25, 2  ;;  %3383 = vmatpush3.bf16.msra.mxu0 %v3668_v21  ;;  %v2362_v31 = vrot.slane %v4818_v25, 6  ;;  %v2245_v63 = vrot.slane %v4818_v25, 4  ;;  %v2004_v28 = vmax.f32 %v4821_v13, 0.0 }
 0x334   :  { %3411 = vmatpush3.bf16.msra.mxu1 %v3669_v59  ;;  %3384 = vmatprep.subr.bf16.mxu0 %v3722_v39 }
 0x335   :  { %v2038_v5 = vsel %vm622_vm3, %v2035_v18, %v2037_v55  ;;  %3412 = vmatprep.mubr.msk.bf16.mxu1 %vm3724_vm8, %v3722_v39  ;;  %3446 = vmatprep.subr.mxu1 %v3722_v39  ;;  %v2363_v3 = vsel %vm1779_vm7, %v2360_v41, %v2362_v31  ;;  %v2246_v49 = vsel %vm1704_vm6, %v2243_v11, %v2245_v63 }
 0x336   :  { %3351 = vmatmul.mubr.msk.bf16.gmra.mxu0 %vm2069_vm10, %v2038_v5  ;;  %v2008_v52 = vpack.c.bf16 %v2004_v28, %v2004_v28 }
 0x337   :  { %3385 = vmatpush3.bf16.msra.mxu0 %v3670_v42  ;;  %3354 = vmatprep.mubr.msk.bf16.mxu0 %vm3724_vm8, %v3722_v39 }
 0x338   :  { %3386 = vmatprep.subr.bf16.mxu0 %v3722_v39 }
 0x33b   :  { %3413 = vmatmul.mubr.msk.bf16.vlgmr.msra.gmra.mxu1 %vm2069_vm10, %v2361_v6  ;;  %3387 = vmatpush3.bf16.msra.mxu0 %v3671_v29 }
 0x33c   :  { %3388 = vmatprep.subr.bf16.mxu0 %v3722_v39  ;;  %3416 = vmatprep.mubr.msk.bf16.mxu1 %vm3724_vm8, %v3722_v39 }
 0x33e   :  { %3355 = vmatmul.mubr.msk.bf16.gmra.mxu0 %vm2069_vm10, %v2037_v55 }
 0x33f   :  { %3389 = vmatpush3.bf16.msra.mxu0 %v3672_v16  ;;  %3390 = vmatprep.mubr.msk.bf16.mxu0 %vm3724_vm8, %v3722_v39 }
 0x340   :  { %3424 = vmatprep.subr.bf16.mxu0 %v3722_v39 }
 0x343   :  { %3417 = vmatmul.mubr.msk.bf16.gmra.mxu1 %vm2069_vm10, %v2363_v3 }
 0x344   :  { %3420 = vmatprep.mubr.msk.bf16.mxu1 %vm3724_vm8, %v3722_v39 }
 0x346   :  { %3391 = vmatmul.mubr.msk.bf16.vlgmr.msra.gmra.mxu0 %vm2069_vm10, %v2244_v45 }
 0x347   :  { %3425 = vmatpush3.bf16.msra.mxu0 %v3673_v51  ;;  %3394 = vmatprep.mubr.msk.bf16.mxu0 %vm3724_vm8, %v3722_v39 }
 0x348   :  { %3426 = vmatprep.subr.bf16.mxu0 %v3722_v39 }
 0x34b   :  { %3421 = vmatmul.mubr.msk.bf16.gmra.mxu1 %vm2069_vm10, %v2362_v31  ;;  %3427 = vmatpush3.bf16.msra.mxu0 %v3674_v27 }
 0x34c   :  { %3428 = vmatprep.subr.bf16.mxu0 %v3722_v39  ;;  %3456 = vmatprep.mubr.msk.f32.mxu1 %vm3724_vm8, %v3722_v39 }
 0x34e   :  { %3395 = vmatmul.mubr.msk.bf16.gmra.mxu0 %vm2069_vm10, %v2246_v49 }
 0x34f   :  { %3429 = vmatpush3.bf16.msra.mxu0 %v3675_v47  ;;  %3398 = vmatprep.mubr.msk.bf16.mxu0 %vm3724_vm8, %v3722_v39 }
 0x350   :  { %3430 = vmatprep.subr.bf16.mxu0 %v3722_v39 }
 0x353   :  { %3431 = vmatpush3.bf16.msra.mxu0 %v3676_v17 }
 0x354   :  { %3432 = vmatprep.subr.bf16.mxu0 %v3722_v39 }
 0x356   :  { %3399 = vmatmul.mubr.msk.bf16.gmra.mxu0 %vm2069_vm10, %v2245_v63 }
 0x357   :  { %3433 = vmatpush3.bf16.msra.mxu0 %v3677_v58  ;;  %3434 = vmatprep.mubr.msk.bf16.mxu0 %vm3724_vm8, %v3722_v39 }
 0x358   :  { %3459 = vmatprep.subr.bf16.mxu0 %v3722_v39 }
 0x35e   :  { %3435 = vmatmul.mubr.msk.bf16.vlgmr.msra.gmra.mxu0 %vm2069_vm10, %v4785_v10 }
 0x35f   :  { %3438 = vmatprep.mubr.msk.bf16.mxu0 %vm3724_vm8, %v3722_v39 }
 0x366   :  { %3439 = vmatmul.mubr.msk.bf16.gmra.mxu0 %vm2069_vm10, %v4818_v25 }
 0x367   :  { %3442 = vmatprep.mubr.msk.bf16.mxu0 %vm3724_vm8, %v3722_v39 }
 0x36e   :  { %3443 = vmatmul.mubr.msk.bf16.gmra.mxu0 %vm2069_vm10, %v2008_v52 }
 0x36f   :  { %3475 = vmatprep.mubr.msk.bf16.mxu0 %vm3724_vm8, %v3722_v39 }
 0x3e3   :  { %v2208_v61 = vpop.f32.mrf.mxu1 }
 0x3e5   :  { %v3370_v2 = vpop.f32.mrf.mxu1 }
 0x3e7   :  { %v2211_v38 = vpop.f32.mrf.mxu1 }
 0x3e9   :  { %v3371_v43 = vpop.f32.mrf.mxu1 }
 0x3eb   :  { %v2216_v57 = vpop.f32.mrf.mxu1 }
 0x3ed   :  { %v3374_v34 = vpop.f32.mrf.mxu1 }
 0x3ee   :  { %v2113_v24 = vpop.f32.mrf.mxu0 }
 0x3ef   :  { %v4910_v32 = vadd.f32 %v2208_v61, %v2113_v24  ;;  %v2219_v26 = vpop.f32.mrf.mxu1 }
 0x3f0   :  { %v3348_v44 = vpop.f32.mrf.mxu0 }
 0x3f1   :  { %v3375_v9 = vpop.f32.mrf.mxu1 }
 0x3f2   :  { %v2116_v1 = vpop.f32.mrf.mxu0 }
 0x3f3   :  { %v2224_v36 = vpop.f32.mrf.mxu1  ;;  %v2212_v52 = vadd.f32 %v2211_v38, %v2116_v1 }
 0x3f4   :  { %v3349_v23 = vpop.f32.mrf.mxu0 }
 0x3f5   :  { %v3378_v7 = vpop.f32.mrf.mxu1 }
 0x3f6   :  { %v2121_v0 = vpop.f32.mrf.mxu0 }
 0x3f7   :  { %v2227_v60 = vpop.f32.mrf.mxu1  ;;  %v2217_v17 = vadd.f32 %v2216_v57, %v2121_v0 }
 0x3f8   :  { %v3352_v54 = vpop.f32.mrf.mxu0 }
 0x3f9   :  { %v3379_v20 = vpop.f32.mrf.mxu1 }
 0x3fa   :  { %v2124_v37 = vpop.f32.mrf.mxu0  ;;  %v3678_v20 = vld [vmem:[%s5015_s8 + $0x38] sm:$0xff]  }
 0x3fb   :  { %v2437_v10 = vpop.f32.mrf.mxu1  ;;  %v2220_v63 = vadd.f32 %v2219_v26, %v2124_v37  ;;  %3460 = vmatpush3.bf16.msra.mxu0 %v3678_v20  ;;  %v3679_v37 = vld [vmem:[%s5015_s8 + $0x30] sm:$0xff]  }
 0x3fc   :  { %v3353_v56 = vpop.f32.mrf.mxu0  ;;  %3461 = vmatprep.subr.bf16.mxu0 %v3722_v39 }
 0x3fd   :  { %v3414_v48 = vpop.f32.mrf.mxu1  ;;  %v3681_v56 = vld [vmem:[%s5015_s8 + $0x20] sm:$0xff]  }
 0x3fe   :  { %v2129_v14 = vpop.f32.mrf.mxu0  ;;  %v3682_v48 = vld [vmem:[%s5015_s8 + $0x18] sm:$0xff]  }
 0x3ff   :  { %v2440_v53 = vpop.f32.mrf.mxu1  ;;  %v2225_v45 = vadd.f32 %v2224_v36, %v2129_v14  ;;  %3462 = vmatpush3.bf16.msra.mxu0 %v3679_v37  ;;  %v3683_v14 = vld [vmem:[%s5015_s8 + $0x10] sm:$0xff]  }
 0x400   :  { %v3356_v50 = vpop.f32.mrf.mxu0  ;;  %3463 = vmatprep.subr.bf16.mxu0 %v3722_v39 }
 0x401   :  { %v3415_v18 = vpop.f32.mrf.mxu1  ;;  %v3685_v50 = vld [vmem:[%s5015_s8] sm:$0xff]  }
 0x402   :  { %v2132_v40 = vpop.f32.mrf.mxu0 }
 0x403   :  { %v2445_v35 = vpop.f32.mrf.mxu1 }
 0x404   :  { %v3357_v4 = vpop.f32.mrf.mxu0 }
 0x405   :  { %v3418_v12 = vpop.f32.mrf.mxu1 }
 0x406   :  { %v2320_v19 = vpop.f32.mrf.mxu0 }
 0x407   :  { %v2448_v46 = vpop.f32.mrf.mxu1  ;;  %v2342_v23 = vadd.f32 %v2320_v19, %v4910_v32  ;;  %v2569_v32 = vld [vmem:[%s5020_s13] sm:$0x3] }
 0x408   :  { %v3392_v15 = vpop.f32.mrf.mxu0 }
 0x409   :  { %v3419_v22 = vpop.f32.mrf.mxu1  ;;  %v2459_v1 = vadd.f32 %v2437_v10, %v2342_v23  ;;  %v3680_v10 = vld [vmem:[%s5015_s8 + $0x28] sm:$0xff]  }
 0x40a   :  { %v2323_v30 = vpop.f32.mrf.mxu0  ;;  %3464 = vmatpush3.bf16.msra.mxu0 %v3680_v10 }
 0x40b   :  { %v2453_v8 = vpop.f32.mrf.mxu1  ;;  %v2343_v34 = vadd.f32 %v2323_v30, %v2212_v52  ;;  %3465 = vmatprep.subr.bf16.mxu0 %v3722_v39  ;;  %v3693_v52 = vld [vmem:[%s5018_s11] sm:$0xff]  }
 0x40c   :  { %v3393_v21 = vpop.f32.mrf.mxu0 }
 0x40d   :  { %v3422_v59 = vpop.f32.mrf.mxu1  ;;  %v2460_v57 = vadd.f32 %v2440_v53, %v2343_v34  ;;  %v3684_v53 = vld [vmem:[%s5015_s8 + $0x8] sm:$0xff]   ;;  %s2950_s8 = sshll.u32 %s3725_s26, 4  ;;  %s2951_s8 = int_to_ptr.vmem [resolvable:$true] %s2950_s8 }
 0x40e   :  { %v2328_v25 = vpop.f32.mrf.mxu0  ;;  %3466 = vmatpush3.bf16.msra.mxu0 %v3681_v56  ;;  %p3703_p1 = scmp.lt.s32.totalorder %s2951_s8, %s2951_s8 }
 0x40f   :  { %v2456_v13 = vpop.f32.mrf.mxu1  ;;  %v2344_v61 = vadd.f32 %v2328_v25, %v2217_v17  ;;  %3467 = vmatprep.subr.bf16.mxu0 %v3722_v39  ;;  %v3690_v17 = vld [vmem:[%s5018_s11 + $0x18] sm:$0xff]  }
 0x410   :  { %v3396_v55 = vpop.f32.mrf.mxu0 }
 0x411   :  { %v3423_v42 = vpop.f32.mrf.mxu1  ;;  %v2461_v7 = vadd.f32 %v2445_v35, %v2344_v61 }
 0x412   :  { %v2331_v5 = vpop.f32.mrf.mxu0  ;;  %3468 = vmatpush3.bf16.msra.mxu0 %v3682_v48 }
 0x413   :  { %v2345_v58 = vadd.f32 %v2331_v5, %v2220_v63  ;;  %3469 = vmatprep.subr.bf16.mxu0 %v3722_v39  ;;  %v3687_v63 = vld [vmem:[%s5018_s11 + $0x30] sm:$0xff]  }
 0x414   :  { %v3397_v41 = vpop.f32.mrf.mxu0 }
 0x415   :  { %v2462_v24 = vadd.f32 %v2448_v46, %v2345_v58  ;;  %v3691_v58 = vld [vmem:[%s5018_s11 + $0x10] sm:$0xff]  }
 0x416   :  { %v2336_v29 = vpop.f32.mrf.mxu0  ;;  %3470 = vmatpush3.bf16.msra.mxu0 %v3683_v14  ;;  %v3261_v14 = vld [vmem:[%s5016_s9] ss:$0 sm:$0xff]  ;;  %s3698_s9 = scalar_lea.vmem %s2951_s8, 32 }
 0x417   :  { %v2346_v47 = vadd.f32 %v2336_v29, %v2225_v45  ;;  %3471 = vmatprep.subr.bf16.mxu0 %v3722_v39  ;;  %p3699_p0 = scmp.ne.s32.totalorder %s2951_s8, %s3698_s9  ;;  %p3704_p2 = scmp.lt.s32.totalorder %s3698_s9, %s3698_s9 }
 0x418   :  { %v3400_v62 = vpop.f32.mrf.mxu0 }
 0x419   :  { %v2463_v2 = vadd.f32 %v2453_v8, %v2346_v47  ;;  %v3688_v47 = vld [vmem:[%s5018_s11 + $0x28] sm:$0xff]   ;;  %p3705_p3 = por %p3704_p2, %p3703_p1 }
 0x41a   :  { %v2339_v6 = vpop.f32.mrf.mxu0  ;;  %3472 = vmatpush3.bf16.msra.mxu0 %v3684_v53 }
 0x41b   :  { %3473 = vmatprep.subr.bf16.mxu0 %v3722_v39  ;;  %p3706_p4 = pnand %p3705_p3, %p3699_p0 }
 0x41c   :  { %v3401_v16 = vpop.f32.mrf.mxu0 }
 0x41d   :  { %v3251_v16 = vld [vmem:[%s5013_s6] ss:$0 sm:$0xff] }
 0x41e   :  { %v2542_v31 = vpop.f32.mrf.mxu0  ;;  %3474 = vmatpush3.bf16.msra.mxu0 %v3685_v50  ;;  %v3262_v50 = vld [vmem:[%s5017_s10] ss:$0 sm:$0xff] }
 0x41f   :  { %v2564_v54 = vadd.f32 %v2542_v31, %v2459_v1 }
 0x420   :  { %v3436_v11 = vpop.f32.mrf.mxu0 }
 0x421   :  { %v3252_v11 = vld [vmem:[%s5014_s7] ss:$0 sm:$0xff] }
 0x422   :  { %v2545_v3 = vpop.f32.mrf.mxu0 }
 0x423   :  { %v2565_v60 = vadd.f32 %v2545_v3, %v2460_v57 }
 0x424   :  { %v3437_v33 = vpop.f32.mrf.mxu0 }
 0x426   :  { %v2550_v51 = vpop.f32.mrf.mxu0 }
 0x427   :  { %v2566_v0 = vadd.f32 %v2550_v51, %v2461_v7 }
 0x428   :  { %v3440_v27 = vpop.f32.mrf.mxu0 }
 0x429   :  { %v3686_v27 = vld [vmem:[%s5018_s11 + $0x38] sm:$0xff]  }
 0x42a   :  { %v2553_v49 = vpop.f32.mrf.mxu0 }
 0x42b   :  { %v2567_v36 = vadd.f32 %v2553_v49, %v2462_v24  ;;  %v3689_v49 = vld [vmem:[%s5018_s11 + $0x20] sm:$0xff]  }
 0x42c   :  { %v3441_v28 = vpop.f32.mrf.mxu0 }
 0x42d   :  { %v3692_v28 = vld [vmem:[%s5018_s11 + $0x8] sm:$0xff]  }
 0x42e   :  { %v2558_v43 = vpop.f32.mrf.mxu0 }
 0x42f   :  { %v2568_v44 = vadd.f32 %v2558_v43, %v2463_v2 }
 0x430   :  { %v3444_v9 = vpop.f32.mrf.mxu0 }
 0x431   :  { %3447 = vmatpush3.msk.msra.mxu1 %vm2574_vm11, %v2568_v44 }
 0x432   :  { %v2561_v26 = vpop.f32.mrf.mxu0  ;;  %3448 = vmatprep.subr.mxu1 %v3722_v39 }
 0x433   :  { %3449 = vmatpush3.msra.mxu1 %v2567_v36 }
 0x434   :  { %v3445_v38 = vpop.f32.mrf.mxu0  ;;  %3450 = vmatprep.subr.mxu1 %v3722_v39 }
 0x435   :  { %3451 = vmatpush3.msra.mxu1 %v2566_v0 }
 0x436   :  { %3452 = vmatprep.subr.mxu1 %v3722_v39 }
 0x437   :  { %3453 = vmatpush3.msra.mxu1 %v2565_v60 }
 0x438   :  { %3454 = vmatprep.subr.mxu1 %v3722_v39 }
 0x439   :  { %3455 = vmatpush3.msra.mxu1 %v2564_v54 }
 0x43a   :  { %3457 = vmatmul.mubr.msk.f32.vlgmr.msra.gmra.mxu1 %vm2570_vm12, %v2569_v32  ;;  %3479 = vmatprep.subr.bf16.mxu1 %v3722_v39 }
 0x43b   :  { %3495 = vmatprep.mubr.msk.bf16.mxu1 %vm3724_vm8, %v3722_v39  ;;  %3480 = vmatpush3.bf16.msra.mxu1 %v3686_v27 }
 0x43c   :  { %3481 = vmatprep.subr.bf16.mxu1 %v3722_v39 }
 0x43f   :  { %3482 = vmatpush3.bf16.msra.mxu1 %v3687_v63 }
 0x440   :  { %3483 = vmatprep.subr.bf16.mxu1 %v3722_v39 }
 0x443   :  { %3484 = vmatpush3.bf16.msra.mxu1 %v3688_v47 }
 0x444   :  { %3485 = vmatprep.subr.bf16.mxu1 %v3722_v39 }
 0x447   :  { %3486 = vmatpush3.bf16.msra.mxu1 %v3689_v49 }
 0x448   :  { %3487 = vmatprep.subr.bf16.mxu1 %v3722_v39 }
 0x44b   :  { %3488 = vmatpush3.bf16.msra.mxu1 %v3690_v17 }
 0x44c   :  { %3489 = vmatprep.subr.bf16.mxu1 %v3722_v39 }
 0x44f   :  { %3490 = vmatpush3.bf16.msra.mxu1 %v3691_v58 }
 0x450   :  { %3491 = vmatprep.subr.bf16.mxu1 %v3722_v39 }
 0x453   :  { %3492 = vmatpush3.bf16.msra.mxu1 %v3692_v28 }
 0x454   :  { %3493 = vmatprep.subr.bf16.mxu1 %v3722_v39 }
 0x457   :  { %3494 = vmatpush3.bf16.msra.mxu1 %v3693_v52 }
 0x4fa   :  { %v2644_v18 = vpop.f32.mrf.mxu1 }
 0x4fb   :  { %v2650_v40 = vsel %vm1779_vm7, %v2644_v18, 0.0 }
 0x4fc   :  { %v2651_v35 = vrot.slane %v2650_v40, 4  ;;  %v3458_v4 = vpop.f32.mrf.mxu1 }
 0x4fe   :  { %v2652_v12 = vadd.f32 %v2651_v35, %v2650_v40 }
 0x500   :  { %v2653_v19 = vrot.slane %v2652_v12, 2 }
 0x502   :  { %v2654_v46 = vadd.f32 %v2653_v19, %v2652_v12  ;;  %v3263_v12 = vld [vmem:[%s5019_s12] ss:$0 sm:$0xff] }
 0x504   :  { %v2655_v15 = vrot.slane %v2654_v46, 1 }
 0x506   :  { %v2656_v22 = vadd.f32 %v2655_v15, %v2654_v46 }
 0x508   :  { %v2658_v30 = vmul.f32 0.5, %v2656_v22 }
 0x50a   :  { %v2659_v8 = vsub.f32 %v2644_v18, %v2658_v30 }
 0x50c   :  { %v2660_v21 = vmul.f32 %v2659_v8, %v2659_v8 }
 0x50e   :  { %v2661_v59 = vsel %vm1779_vm7, %v2660_v21, 0.0 }
 0x50f   :  { %v2662_v25 = vrot.slane %v2661_v59, 4 }
 0x511   :  { %v2663_v13 = vadd.f32 %v2662_v25, %v2661_v59 }
 0x513   :  { %v2664_v55 = vrot.slane %v2663_v13, 2 }
 0x515   :  { %v2665_v42 = vadd.f32 %v2664_v55, %v2663_v13 }
 0x517   :  { %v2666_v5 = vrot.slane %v2665_v42, 1 }
 0x519   :  { %v2667_v41 = vadd.f32 %v2666_v5, %v2665_v42 }
 0x51b   :  { %v2668_v29 = vmul.f32 0.5, %v2667_v41 }
 0x51d   :  { %v2669_v62 = vadd.f32 1e-05, %v2668_v29 }
 0x51f   :  { %3694 = vrsqrt.f32 %v2669_v62 }
 0x52c   :  { %v3695_v6 = vpop.eup %3694 }
 0x52d   :  { %v2671_v31 = vmul.f32 %v3695_v6, %v2659_v8 }
 0x52f   :  { %v2678_v3 = vmul.f32 %v3251_v16, %v2671_v31 }
 0x531   :  { %v2685_v33 = vadd.f32 %v3252_v11, %v2678_v3 }
 0x533   :  { %v2686_v51 = vmax.f32 %v2685_v33, 0.0 }
 0x535   :  { %v2687_v45 = vpack.c.bf16 %v2686_v51, %v2686_v51 }
 0x537   :  { %3476 = vmatmul.mubr.bf16.vlgmr.msra.gmra.mxu0 %v2687_v45 }
 0x5f7   :  { %v2786_v61 = vpop.f32.mrf.mxu0 }
 0x5f8   :  { %v2794_v2 = vsel %vm1779_vm7, %v2786_v61, 0.0 }
 0x5f9   :  { %v2795_v43 = vrot.slane %v2794_v2, 4  ;;  %v3477_v34 = vpop.f32.mrf.mxu0 }
 0x5fb   :  { %v2796_v24 = vadd.f32 %v2795_v43, %v2794_v2  ;;  %v2789_v44 = vpop.f32.mrf.mxu0 }
 0x5fd   :  { %v2797_v9 = vrot.slane %v2796_v24, 2  ;;  %v3478_v23 = vpop.f32.mrf.mxu0 }
 0x5ff   :  { %v2798_v7 = vadd.f32 %v2797_v9, %v2796_v24 }
 0x601   :  { %v2799_v36 = vrot.slane %v2798_v7, 1 }
 0x603   :  { %v2800_v26 = vadd.f32 %v2799_v36, %v2798_v7 }
 0x605   :  { %v2801_v57 = vmul.f32 0.5, %v2800_v26 }
 0x607   :  { %v2802_v0 = vsub.f32 %v2786_v61, %v2801_v57 }
 0x609   :  { %v2803_v38 = vmul.f32 %v2802_v0, %v2802_v0 }
 0x60b   :  { %v2804_v1 = vsel %vm1779_vm7, %v2803_v38, 0.0 }
 0x60c   :  { %v2805_v60 = vrot.slane %v2804_v1, 4 }
 0x60e   :  { %v2806_v39 = vadd.f32 %v2805_v60, %v2804_v1 }
 0x610   :  { %v2807_v54 = vrot.slane %v2806_v39, 2 }
 0x612   :  { %v2808_v32 = vadd.f32 %v2807_v54, %v2806_v39 }
 0x614   :  { %v2809_v20 = vrot.slane %v2808_v32, 1 }
 0x616   :  { %v2810_v37 = vadd.f32 %v2809_v20, %v2808_v32 }
 0x618   :  { %v2811_v10 = vmul.f32 0.5, %v2810_v37 }
 0x61a   :  { %v2812_v56 = vadd.f32 1e-05, %v2811_v10 }
 0x61c   :  { %3696 = vrsqrt.f32 %v2812_v56 }
 0x629   :  { %v3697_v48 = vpop.eup %3696 }
 0x62a   :  { %v2814_v53 = vmul.f32 %v3697_v48, %v2802_v0 }
 0x62c   :  { %v2821_v18 = vmul.f32 %v3261_v14, %v2814_v53 }
 0x62e   :  { %v2828_v40 = vadd.f32 %v3262_v50, %v2821_v18 }
 0x630   :  { %v2829_v35 = vmax.f32 %v2828_v40, 0.0 }
 0x632   :  { %v2830_v4 = vpack.c.bf16 %v2829_v35, %v2829_v35 }
 0x634   :  { %3496 = vmatmul.mubr.bf16.vlgmr.msra.gmra.mxu1 %v2830_v4 }
 0x6f4   :  { %v2936_v19 = vpop.f32.mrf.mxu1 }
 0x6f5   :  { %v2937_v46 = vadd.f32 %v3263_v12, %v2936_v19 }
 0x6f6   :  { %v3497_v15 = vpop.f32.mrf.mxu1 }
 0x6f7   :  { %2943 = vst.msk [vmem:[#allocation2] sm:$0x3] %vm2942_vm13, %v2937_v46 }
 0x6f8   :  { %v2939_v22 = vpop.f32.mrf.mxu1 }
 0x6f9   :  { %3709 = shalt.err (!%p3706_p4)
}
 0x6fa   :  { %2953 = dma.vmem_to_hbm [thread:$0]  %s2951_s8, 32, %s5021_s14, [#allocation3]   ;;  %v3498_v30 = vpop.f32.mrf.mxu1 }
 0x6fb   :  { %3718 = dma.done.wait [#allocation3], 32  }
 0x6fc   :  { %3719 = vsyncadd [#allocation3], 4294967264 }
 0x6fd   :  { %2957 = vsyncpa [#allocation3], 1 }

</bundles_post_ra>
